<compile_context>
chip_gen: v6e
topology: v6e:2x2x1
jax: 0.10.0
libtpu: 0.0.40
codegen_flags: <defaults>
</compile_context>

<pallas_src>
import numpy as np
import jax
import jax.numpy as jnp
from jax import lax
from jax.experimental import pallas as pl
from jax.experimental.pallas import tpu as pltpu

# ---------------- small synthetic config ----------------
B = 2
PATCH_W, PATCH_H = 4, 4          # patch grid: PATCH_W rows, PATCH_H cols (torch reshape order)
HW = PATCH_W * PATCH_H
L = 1 + HW                       # tokens incl. cls (17)
LP = 24                          # tokens padded to a multiple of 8 (sublane alignment)
BLP = B * LP
C = 32                           # input_dim
DIM = 8                          # adapter bottleneck dim
META = 64                        # meta_net hidden/output width
NUM_MASK = 4                     # rows of mask_token.weight
TAPS = 9
TD = TAPS * DIM                  # 72: one im2col row-block per output channel
KK = DIM * DIM * 9               # 576: flattened (dim, dim, 3, 3) conv weight


def quick_gelu(v):
    return v * jax.nn.sigmoid(1.702 * v)


def _tap_offsets():
    # flattened patch-token offset per tap (ky, kx), tap = ky*3 + kx
    return [(ky - 1) * PATCH_H + (kx - 1) for ky in range(3) for kx in range(3)]


def _hyper_perm_flat():
    """(KK,) torch flat row ids so hypernet output column o*72 + tap*8 + i equals
    convw[o, i, ky, kx] (tap = ky*3 + kx)."""
    idx = np.arange(KK).reshape(DIM, DIM, 3, 3)       # [o, i, ky, kx]
    return idx.transpose(0, 2, 3, 1).reshape(-1)


def _build_im2col_mask():
    """(BLP, 72) tap-validity mask over the padded token layout.  Per sample: cls row
    keeps only the centre tap (F.conv2d on a 1x1 map with padding=1), patch rows keep
    in-bounds taps, pad rows are all-zero."""
    m = np.zeros((BLP, TD), np.float32)
    for b in range(B):
        base = b * LP
        m[base, 4 * DIM:5 * DIM] = 1.0                # cls: centre tap only
        for p in range(HW):
            r, c = p // PATCH_H, p % PATCH_H
            for ky in range(3):
                for kx in range(3):
                    if 0 <= r + ky - 1 < PATCH_W and 0 <= c + kx - 1 < PATCH_H:
                        t = ky * 3 + kx
                        m[base + 1 + p, t * DIM:(t + 1) * DIM] = 1.0
    return m


def _build_seg():
    """(B, BLP) segment matrix: 1 at sample b's patch tokens (excludes cls and pad rows)."""
    s = np.zeros((B, BLP), np.float32)
    for b in range(B):
        s[b, b * LP + 1:b * LP + 1 + HW] = 1.0
    return s


# ---------------- fused kernel ----------------
def fused_kernel(x_ref, mw_ref, du_ref, hw_ref, bias_ref, mask_ref, seg_ref, out_ref):
    f32 = jnp.float32
    x2 = x_ref[...]                                       # (BLP, C)

    # ---- unpack the packed parameter blocks (static slices, aligned starts) ----
    m1w = mw_ref[0:C, :]                                  # (C, META)
    m2w = mw_ref[C:C + META, :]                           # (META, META)
    mtw = mw_ref[C + META:C + META + NUM_MASK, :]         # (NUM_MASK, META)
    dw = du_ref[0:C, 0:DIM]                               # (C, DIM)
    uw = du_ref[C:C + DIM, :]                             # (DIM, C)
    m1b = bias_ref[0:1, 0:META]
    m2b = bias_ref[1:2, 0:META]
    db = bias_ref[2:3, 0:DIM]
    ub = bias_ref[3:4, 0:C]
    hb = bias_ref[4:5, :]                                 # (1, KK)
    mask_c = mask_ref[...]                                # (BLP, TD)
    seg = seg_ref[...]                                    # (B, BLP)

    # ---- shared matmuls over every token of every sample ----
    h = jnp.maximum(jnp.dot(x2, m1w, preferred_element_type=f32) + m1b, 0.0)
    pf = jnp.dot(h, m2w, preferred_element_type=f32) + m2b                 # (BLP, META)
    xd = quick_gelu(jnp.dot(x2, dw, preferred_element_type=f32) + db)      # (BLP, DIM)

    # ---- mask path, batched over all samples ----
    logits = lax.dot_general(mtw, pf, (((1,), (1,)), ((), ())),
                             preferred_element_type=f32)                   # (NUM_MASK, BLP)
    validrow = jnp.sum(seg, axis=0, keepdims=True)                         # (1, BLP) 1 = patch token
    logits = logits + (validrow - 1.0) * 1e30                              # -1e30 at cls/pad lanes
    logits = logits - jnp.max(logits, axis=1, keepdims=True)
    e = jnp.exp(logits)                                                    # exactly 0 at masked lanes
    denom = lax.dot_general(e, seg, (((1,), (1,)), ((), ())),
                            preferred_element_type=f32)                    # (NUM_MASK, B) per-sample sums
    rlane = jnp.dot(pl.reciprocal(denom, approx=True), seg,
                    preferred_element_type=f32)                            # (NUM_MASK, BLP)
    wsum = jnp.sum(e * rlane, axis=0, keepdims=True)                       # (1, BLP) sum of softmaxes
    mwf = jnp.dot(seg * wsum, pf, preferred_element_type=f32)              # (B, META) pooled features

    # ---- conv hypernet: ONE matmul for all samples & output channels ----
    w_flat = jnp.dot(mwf, hw_ref[...], preferred_element_type=f32) + hb    # (B, KK)
    # TODO(synk): torch.save of the per-sample conv weight is file I/O, skipped.

    # ---- im2col over the whole batch via XLU rolls; wrap-around rows are masked out ----
    pieces = [xd if o == 0 else pltpu.roll(xd, shift=(-o) % BLP, axis=0)
              for o in _tap_offsets()]
    im2col = jnp.concatenate(pieces, axis=1) * mask_c                      # (BLP, TD)

    # ---- per-sample 3x3 conv as a single im2col matmul (aligned 24-row / 8-row slices) ----
    ys = []
    for b in range(B):                                                     # static unroll, B = 2
        w2 = jnp.concatenate(
            [w_flat[b:b + 1, o * TD:(o + 1) * TD] for o in range(DIM)], axis=0)   # (DIM, TD)
        ys.append(lax.dot_general(im2col[b * LP:(b + 1) * LP, :], w2,
                                  (((1,), (1,)), ((), ())),
                                  preferred_element_type=f32))             # (LP, DIM)

    y = quick_gelu(jnp.concatenate(ys, axis=0))                            # (BLP, DIM)
    # TODO(synk): nn.Dropout(0.1) implemented as eval-mode identity (no RNG drop).
    y = jnp.dot(y, uw, preferred_element_type=f32) + ub                    # (BLP, C)
    out_ref[...] = x2 + y


# ---------------- wrapper ----------------
def convpass_forward(x, p):
    Bx, Lx, Cx = x.shape

    # pad token axis 17 -> 24 so every per-sample slice / concat is sublane aligned
    x_pad = jnp.pad(x, ((0, 0), (0, LP - Lx), (0, 0)))
    x2 = x_pad.reshape(Bx * LP, Cx)

    # torch nn.Linear weights are (out, in); transpose for row-vector matmuls and pack
    # the small operands together so the call issues few HBM->VMEM DMAs.
    mw_pack = jnp.concatenate([p['meta1_w'].T, p['meta2_w'].T, p['mask_token_w']],
                              axis=0)                              # (C+META+NUM_MASK, META)

    du_pack = jnp.zeros((C + DIM, C), jnp.float32)
    du_pack = du_pack.at[0:C, 0:DIM].set(p['down_w'].T)            # adapter_down (C, DIM)
    du_pack = du_pack.at[C:C + DIM, :].set(p['up_w'].T)            # adapter_up   (DIM, C)

    perm = _hyper_perm_flat()
    hw_big = p['hyper_w'][perm].T                                  # (META, KK) tap-major per out-ch
    hb_flat = p['hyper_b'][perm]                                   # (KK,)

    bias_pack = jnp.zeros((8, KK), jnp.float32)
    bias_pack = bias_pack.at[0, 0:META].set(p['meta1_b'])
    bias_pack = bias_pack.at[1, 0:META].set(p['meta2_b'])
    bias_pack = bias_pack.at[2, 0:DIM].set(p['down_b'])
    bias_pack = bias_pack.at[3, 0:C].set(p['up_b'])
    bias_pack = bias_pack.at[4, :].set(hb_flat)

    mask_c = jnp.asarray(_build_im2col_mask())                     # (BLP, TD)
    seg = jnp.asarray(_build_seg())                                # (B, BLP)

    # Single gridless call: everything comfortably VMEM-resident at this toy size.
    # TODO(synk): at ViT scale / on v7x, tile over (sample, token) with a BlockSpec grid
    # and dimension_semantics=("parallel",...) instead of one fully-resident call.
    out2 = pl.pallas_call(
        fused_kernel,
        out_shape=jax.ShapeDtypeStruct((Bx * LP, Cx), jnp.float32),
        in_specs=[pl.BlockSpec(memory_space=pltpu.MemorySpace.VMEM)] * 7,
        out_specs=pl.BlockSpec(memory_space=pltpu.MemorySpace.VMEM),
    )(x2, mw_pack, du_pack, hw_big, bias_pack, mask_c, seg)

    return out2.reshape(Bx, LP, Cx)[:, :Lx, :]


# ---------------- deterministic parameter init ----------------
def init_params(key):
    ks = jax.random.split(key, 10)
    s = 0.1
    p = {}
    p['meta1_w'] = jax.random.normal(ks[0], (META, C), jnp.float32) * s
    p['meta1_b'] = jax.random.normal(ks[1], (META,), jnp.float32) * s
    p['meta2_w'] = jax.random.normal(ks[2], (META, META), jnp.float32) * s
    p['meta2_b'] = jax.random.normal(ks[3], (META,), jnp.float32) * s
    p['mask_token_w'] = jax.random.normal(ks[4], (NUM_MASK, META), jnp.float32) * s
    # conv_hypernet modeled as Linear(META, DIM*DIM*9); output reshaped (O, I, 3, 3).
    p['hyper_w'] = jax.random.normal(ks[5], (KK, META), jnp.float32) * s
    p['hyper_b'] = jax.random.normal(ks[6], (KK,), jnp.float32) * s
    # adapter_down: xavier_uniform, zero bias (as in module __init__).
    lim = float(np.sqrt(6.0 / (C + DIM)))
    p['down_w'] = jax.random.uniform(ks[7], (DIM, C), jnp.float32, -lim, lim)
    p['down_b'] = jnp.zeros((DIM,), jnp.float32)
    # adapter_up: module init is zeros; small random here so the path is exercised.
    p['up_w'] = jax.random.normal(ks[8], (C, DIM), jnp.float32) * 0.2
    p['up_b'] = jnp.zeros((C,), jnp.float32)
    return p


# ---------------- pure-JAX reference (mirrors the PyTorch forward) ----------------
def reference_forward(x, p):
    h = jnp.maximum(jnp.einsum('blc,mc->blm', x, p['meta1_w']) + p['meta1_b'], 0.0)
    pf = jnp.einsum('blm,nm->bln', h, p['meta2_w']) + p['meta2_b']         # (B, L, META)
    pft = pf[:, 1:, :]
    logits = jnp.einsum('blm,km->blk', pft, p['mask_token_w'])             # (B, HW, NUM_MASK)
    mask = jax.nn.softmax(jnp.transpose(logits, (2, 0, 1)), axis=-1)       # (NUM_MASK, B, HW)
    mwf = jnp.zeros_like(pft)
    for mid in range(NUM_MASK):
        mwf = mwf + mask[mid][..., None] * pft
    mwf = mwf.sum(axis=1)                                                  # (B, META)
    outs = []
    for idx in range(B):
        flat = mwf[idx] @ p['hyper_w'].T + p['hyper_b']
        convw = flat.reshape(DIM, DIM, 3, 3)                               # (O, I, KH, KW)
        xd = quick_gelu(x[idx] @ p['down_w'].T + p['down_b'])              # (L, DIM)
        xp = xd[1:].reshape(1, PATCH_W, PATCH_H, DIM).transpose(0, 3, 1, 2)
        yp = lax.conv_general_dilated(xp, convw, (1, 1), 'SAME',
                                      dimension_numbers=('NCHW', 'OIHW', 'NCHW'))
        yp = yp.transpose(0, 2, 3, 1).reshape(HW, DIM)
        ycls = xd[0:1] @ convw[:, :, 1, 1].T
        y = quick_gelu(jnp.concatenate([ycls, yp], axis=0))
        y = y @ p['up_w'].T + p['up_b']
        outs.append(y)
    return jnp.stack(outs, axis=0) + x


if __name__ == "__main__":
    key = jax.random.PRNGKey(0)
    kx, kp = jax.random.split(key)
    x = jax.random.normal(kx, (B, L, C), jnp.float32)
    params = init_params(kp)

    out = convpass_forward(x, params)
    out = jax.block_until_ready(out)
    assert out.shape == (B, L, C)

    ref = reference_forward(x, params)
    np.testing.assert_allclose(np.asarray(out), np.asarray(ref), rtol=2e-2, atol=2e-2)
    print("KERNEL_OK")
</pallas_src>

<mosaic_0001>
module attributes {stable_mosaic.version = 11 : i64} {
  func.func @fused_kernel(%arg0: memref<48x32xf32, #tpu.memory_space<vmem>>, %arg1: memref<100x64xf32, #tpu.memory_space<vmem>>, %arg2: memref<40x32xf32, #tpu.memory_space<vmem>>, %arg3: memref<64x576xf32, #tpu.memory_space<vmem>>, %arg4: memref<8x576xf32, #tpu.memory_space<vmem>>, %arg5: memref<48x72xf32, #tpu.memory_space<vmem>>, %arg6: memref<2x48xf32, #tpu.memory_space<vmem>>, %arg7: memref<48x32xf32, #tpu.memory_space<vmem>>) attributes {dimension_semantics = [], scalar_prefetch = 0 : i64, scratch_operands = 0 : i64, tpu.core_type = #tpu.core_type<tc>} {
    %c0 = arith.constant 0 : index
    %c0_0 = arith.constant 0 : index
    %0 = vector.load %arg0[%c0, %c0_0] : memref<48x32xf32, #tpu.memory_space<vmem>>, vector<48x32xf32>
    %c0_1 = arith.constant 0 : index
    %c0_2 = arith.constant 0 : index
    %1 = vector.load %arg1[%c0_1, %c0_2] : memref<100x64xf32, #tpu.memory_space<vmem>>, vector<32x64xf32>
    %c32 = arith.constant 32 : index
    %c0_3 = arith.constant 0 : index
    %2 = vector.load %arg1[%c32, %c0_3] : memref<100x64xf32, #tpu.memory_space<vmem>>, vector<64x64xf32>
    %c96 = arith.constant 96 : index
    %c0_4 = arith.constant 0 : index
    %3 = vector.load %arg1[%c96, %c0_4] : memref<100x64xf32, #tpu.memory_space<vmem>>, vector<4x64xf32>
    %c0_5 = arith.constant 0 : index
    %c0_6 = arith.constant 0 : index
    %4 = vector.load %arg2[%c0_5, %c0_6] : memref<40x32xf32, #tpu.memory_space<vmem>>, vector<32x8xf32>
    %c32_7 = arith.constant 32 : index
    %c0_8 = arith.constant 0 : index
    %5 = vector.load %arg2[%c32_7, %c0_8] : memref<40x32xf32, #tpu.memory_space<vmem>>, vector<8x32xf32>
    %c0_9 = arith.constant 0 : index
    %c0_10 = arith.constant 0 : index
    %6 = vector.load %arg4[%c0_9, %c0_10] : memref<8x576xf32, #tpu.memory_space<vmem>>, vector<1x64xf32>
    %c1 = arith.constant 1 : index
    %c0_11 = arith.constant 0 : index
    %7 = vector.load %arg4[%c1, %c0_11] : memref<8x576xf32, #tpu.memory_space<vmem>>, vector<1x64xf32>
    %c2 = arith.constant 2 : index
    %c0_12 = arith.constant 0 : index
    %8 = vector.load %arg4[%c2, %c0_12] : memref<8x576xf32, #tpu.memory_space<vmem>>, vector<1x8xf32>
    %c3 = arith.constant 3 : index
    %c0_13 = arith.constant 0 : index
    %9 = vector.load %arg4[%c3, %c0_13] : memref<8x576xf32, #tpu.memory_space<vmem>>, vector<1x32xf32>
    %c4 = arith.constant 4 : index
    %c0_14 = arith.constant 0 : index
    %10 = vector.load %arg4[%c4, %c0_14] : memref<8x576xf32, #tpu.memory_space<vmem>>, vector<1x576xf32>
    %c0_15 = arith.constant 0 : index
    %c0_16 = arith.constant 0 : index
    %11 = vector.load %arg5[%c0_15, %c0_16] : memref<48x72xf32, #tpu.memory_space<vmem>>, vector<48x72xf32>
    %c0_17 = arith.constant 0 : index
    %c0_18 = arith.constant 0 : index
    %12 = vector.load %arg6[%c0_17, %c0_18] : memref<2x48xf32, #tpu.memory_space<vmem>>, vector<2x48xf32>
    %cst = arith.constant dense<0.000000e+00> : vector<48x64xf32>
    %13 = tpu.matmul %0, %1, %cst {dimension_numbers = #tpu.dot_dimension_numbers<[1], [0], [0], [1], [0, 0, 1, 1], [], []>} : vector<48x32xf32>, vector<32x64xf32>, vector<48x64xf32> -> vector<48x64xf32>
    %14 = vector.broadcast %6 : vector<1x64xf32> to vector<48x64xf32>
    %15 = arith.addf %13, %14 : vector<48x64xf32>
    %cst_19 = arith.constant 0.000000e+00 : f32
    %16 = vector.broadcast %cst_19 : f32 to vector<48x64xf32>
    %17 = arith.maximumf %15, %16 : vector<48x64xf32>
    %cst_20 = arith.constant dense<0.000000e+00> : vector<48x64xf32>
    %18 = tpu.matmul %17, %2, %cst_20 {dimension_numbers = #tpu.dot_dimension_numbers<[1], [0], [0], [1], [0, 0, 1, 1], [], []>} : vector<48x64xf32>, vector<64x64xf32>, vector<48x64xf32> -> vector<48x64xf32>
    %19 = vector.broadcast %7 : vector<1x64xf32> to vector<48x64xf32>
    %20 = arith.addf %18, %19 : vector<48x64xf32>
    %cst_21 = arith.constant dense<0.000000e+00> : vector<48x8xf32>
    %21 = tpu.matmul %0, %4, %cst_21 {dimension_numbers = #tpu.dot_dimension_numbers<[1], [0], [0], [1], [0, 0, 1, 1], [], []>} : vector<48x32xf32>, vector<32x8xf32>, vector<48x8xf32> -> vector<48x8xf32>
    %22 = vector.broadcast %8 : vector<1x8xf32> to vector<48x8xf32>
    %23 = arith.addf %21, %22 : vector<48x8xf32>
    %cst_22 = arith.constant 1.702000e+00 : f32
    %24 = vector.broadcast %cst_22 : f32 to vector<48x8xf32>
    %25 = arith.mulf %24, %23 : vector<48x8xf32>
    %26 = arith.negf %25 : vector<48x8xf32>
    %27 = math.exp %26 : vector<48x8xf32>
    %cst_23 = arith.constant 1.000000e+00 : f32
    %28 = vector.broadcast %cst_23 : f32 to vector<48x8xf32>
    %29 = arith.addf %28, %27 : vector<48x8xf32>
    %30 = arith.divf %28, %29 : vector<48x8xf32>
    %31 = arith.mulf %23, %30 : vector<48x8xf32>
    %cst_24 = arith.constant dense<0.000000e+00> : vector<4x48xf32>
    %32 = tpu.matmul %3, %20, %cst_24 {dimension_numbers = #tpu.dot_dimension_numbers<[1], [1], [0], [0], [0, 0, 1, 0], [], []>} : vector<4x64xf32>, vector<48x64xf32>, vector<4x48xf32> -> vector<4x48xf32>
    %cst_25 = arith.constant dense<0.000000e+00> : vector<48xf32>
    %33 = vector.multi_reduction <add>, %12, %cst_25 [0] : vector<2x48xf32> to vector<48xf32>
    %34 = vector.shape_cast %33 : vector<48xf32> to vector<1x48xf32>
    %cst_26 = arith.constant 1.000000e+00 : f32
    %35 = vector.broadcast %cst_26 : f32 to vector<1x48xf32>
    %36 = arith.subf %34, %35 : vector<1x48xf32>
    %cst_27 = arith.constant 1.000000e+30 : f32
    %37 = vector.broadcast %cst_27 : f32 to vector<1x48xf32>
    %38 = arith.mulf %36, %37 : vector<1x48xf32>
    %39 = vector.broadcast %38 : vector<1x48xf32> to vector<4x48xf32>
    %40 = arith.addf %32, %39 : vector<4x48xf32>
    %cst_28 = arith.constant dense<0xFF800000> : vector<4xf32>
    %41 = vector.multi_reduction <maximumf>, %40, %cst_28 [1] : vector<4x48xf32> to vector<4xf32>
    %42 = vector.shape_cast %41 : vector<4xf32> to vector<4x1xf32>
    %43 = vector.broadcast %42 : vector<4x1xf32> to vector<4x48xf32>
    %44 = arith.subf %40, %43 : vector<4x48xf32>
    %45 = math.exp %44 : vector<4x48xf32>
    %cst_29 = arith.constant dense<0.000000e+00> : vector<4x2xf32>
    %46 = tpu.matmul %45, %12, %cst_29 {dimension_numbers = #tpu.dot_dimension_numbers<[1], [1], [0], [0], [0, 0, 1, 0], [], []>} : vector<4x48xf32>, vector<2x48xf32>, vector<4x2xf32> -> vector<4x2xf32>
    %47 = tpu.reciprocal %46 {approx = true} : vector<4x2xf32> -> vector<4x2xf32>
    %cst_30 = arith.constant dense<0.000000e+00> : vector<4x48xf32>
    %48 = tpu.matmul %47, %12, %cst_30 {dimension_numbers = #tpu.dot_dimension_numbers<[1], [0], [0], [1], [0, 0, 1, 1], [], []>} : vector<4x2xf32>, vector<2x48xf32>, vector<4x48xf32> -> vector<4x48xf32>
    %49 = arith.mulf %45, %48 : vector<4x48xf32>
    %cst_31 = arith.constant dense<0.000000e+00> : vector<48xf32>
    %50 = vector.multi_reduction <add>, %49, %cst_31 [0] : vector<4x48xf32> to vector<48xf32>
    %51 = vector.shape_cast %50 : vector<48xf32> to vector<1x48xf32>
    %52 = vector.broadcast %51 : vector<1x48xf32> to vector<2x48xf32>
    %53 = arith.mulf %12, %52 : vector<2x48xf32>
    %cst_32 = arith.constant dense<0.000000e+00> : vector<2x64xf32>
    %54 = tpu.matmul %53, %20, %cst_32 {dimension_numbers = #tpu.dot_dimension_numbers<[1], [0], [0], [1], [0, 0, 1, 1], [], []>} : vector<2x48xf32>, vector<48x64xf32>, vector<2x64xf32> -> vector<2x64xf32>
    %c0_33 = arith.constant 0 : index
    %c0_34 = arith.constant 0 : index
    %55 = vector.load %arg3[%c0_33, %c0_34] : memref<64x576xf32, #tpu.memory_space<vmem>>, vector<64x576xf32>
    %cst_35 = arith.constant dense<0.000000e+00> : vector<2x576xf32>
    %56 = tpu.matmul %54, %55, %cst_35 {dimension_numbers = #tpu.dot_dimension_numbers<[1], [0], [0], [1], [0, 0, 1, 1], [], []>} : vector<2x64xf32>, vector<64x576xf32>, vector<2x576xf32> -> vector<2x576xf32>
    %57 = vector.broadcast %10 : vector<1x576xf32> to vector<2x576xf32>
    %58 = arith.addf %56, %57 : vector<2x576xf32>
    %c5_i32 = arith.constant 5 : i32
    %59 = tpu.dynamic_rotate %31 by %c5_i32 dim 0 : vector<48x8xf32>, i32 -> vector<48x8xf32>
    %c4_i32 = arith.constant 4 : i32
    %60 = tpu.dynamic_rotate %31 by %c4_i32 dim 0 : vector<48x8xf32>, i32 -> vector<48x8xf32>
    %c3_i32 = arith.constant 3 : i32
    %61 = tpu.dynamic_rotate %31 by %c3_i32 dim 0 : vector<48x8xf32>, i32 -> vector<48x8xf32>
    %c1_i32 = arith.constant 1 : i32
    %62 = tpu.dynamic_rotate %31 by %c1_i32 dim 0 : vector<48x8xf32>, i32 -> vector<48x8xf32>
    %c47_i32 = arith.constant 47 : i32
    %63 = tpu.dynamic_rotate %31 by %c47_i32 dim 0 : vector<48x8xf32>, i32 -> vector<48x8xf32>
    %c45_i32 = arith.constant 45 : i32
    %64 = tpu.dynamic_rotate %31 by %c45_i32 dim 0 : vector<48x8xf32>, i32 -> vector<48x8xf32>
    %c44_i32 = arith.constant 44 : i32
    %65 = tpu.dynamic_rotate %31 by %c44_i32 dim 0 : vector<48x8xf32>, i32 -> vector<48x8xf32>
    %c43_i32 = arith.constant 43 : i32
    %66 = tpu.dynamic_rotate %31 by %c43_i32 dim 0 : vector<48x8xf32>, i32 -> vector<48x8xf32>
    %67 = tpu.concatenate %59, %60, %61, %62, %31, %63, %64, %65, %66 in 1 : vector<48x8xf32>, vector<48x8xf32>, vector<48x8xf32>, vector<48x8xf32>, vector<48x8xf32>, vector<48x8xf32>, vector<48x8xf32>, vector<48x8xf32>, vector<48x8xf32> -> vector<48x72xf32>
    %68 = arith.mulf %67, %11 : vector<48x72xf32>
    %69 = vector.extract_strided_slice %58 {offsets = [0, 0], sizes = [1, 72], strides = [1, 1]} : vector<2x576xf32> to vector<1x72xf32>
    %70 = vector.extract_strided_slice %58 {offsets = [0, 72], sizes = [1, 72], strides = [1, 1]} : vector<2x576xf32> to vector<1x72xf32>
    %71 = vector.extract_strided_slice %58 {offsets = [0, 144], sizes = [1, 72], strides = [1, 1]} : vector<2x576xf32> to vector<1x72xf32>
    %72 = vector.extract_strided_slice %58 {offsets = [0, 216], sizes = [1, 72], strides = [1, 1]} : vector<2x576xf32> to vector<1x72xf32>
    %73 = vector.extract_strided_slice %58 {offsets = [0, 288], sizes = [1, 72], strides = [1, 1]} : vector<2x576xf32> to vector<1x72xf32>
    %74 = vector.extract_strided_slice %58 {offsets = [0, 360], sizes = [1, 72], strides = [1, 1]} : vector<2x576xf32> to vector<1x72xf32>
    %75 = vector.extract_strided_slice %58 {offsets = [0, 432], sizes = [1, 72], strides = [1, 1]} : vector<2x576xf32> to vector<1x72xf32>
    %76 = vector.extract_strided_slice %58 {offsets = [0, 504], sizes = [1, 72], strides = [1, 1]} : vector<2x576xf32> to vector<1x72xf32>
    %77 = tpu.concatenate %69, %70, %71, %72, %73, %74, %75, %76 in 0 : vector<1x72xf32>, vector<1x72xf32>, vector<1x72xf32>, vector<1x72xf32>, vector<1x72xf32>, vector<1x72xf32>, vector<1x72xf32>, vector<1x72xf32> -> vector<8x72xf32>
    %78 = vector.extract_strided_slice %68 {offsets = [0, 0], sizes = [24, 72], strides = [1, 1]} : vector<48x72xf32> to vector<24x72xf32>
    %cst_36 = arith.constant dense<0.000000e+00> : vector<24x8xf32>
    %79 = tpu.matmul %78, %77, %cst_36 {dimension_numbers = #tpu.dot_dimension_numbers<[1], [1], [0], [0], [0, 0, 1, 0], [], []>} : vector<24x72xf32>, vector<8x72xf32>, vector<24x8xf32> -> vector<24x8xf32>
    %80 = vector.extract_strided_slice %58 {offsets = [1, 0], sizes = [1, 72], strides = [1, 1]} : vector<2x576xf32> to vector<1x72xf32>
    %81 = vector.extract_strided_slice %58 {offsets = [1, 72], sizes = [1, 72], strides = [1, 1]} : vector<2x576xf32> to vector<1x72xf32>
    %82 = vector.extract_strided_slice %58 {offsets = [1, 144], sizes = [1, 72], strides = [1, 1]} : vector<2x576xf32> to vector<1x72xf32>
    %83 = vector.extract_strided_slice %58 {offsets = [1, 216], sizes = [1, 72], strides = [1, 1]} : vector<2x576xf32> to vector<1x72xf32>
    %84 = vector.extract_strided_slice %58 {offsets = [1, 288], sizes = [1, 72], strides = [1, 1]} : vector<2x576xf32> to vector<1x72xf32>
    %85 = vector.extract_strided_slice %58 {offsets = [1, 360], sizes = [1, 72], strides = [1, 1]} : vector<2x576xf32> to vector<1x72xf32>
    %86 = vector.extract_strided_slice %58 {offsets = [1, 432], sizes = [1, 72], strides = [1, 1]} : vector<2x576xf32> to vector<1x72xf32>
    %87 = vector.extract_strided_slice %58 {offsets = [1, 504], sizes = [1, 72], strides = [1, 1]} : vector<2x576xf32> to vector<1x72xf32>
    %88 = tpu.concatenate %80, %81, %82, %83, %84, %85, %86, %87 in 0 : vector<1x72xf32>, vector<1x72xf32>, vector<1x72xf32>, vector<1x72xf32>, vector<1x72xf32>, vector<1x72xf32>, vector<1x72xf32>, vector<1x72xf32> -> vector<8x72xf32>
    %89 = vector.extract_strided_slice %68 {offsets = [24, 0], sizes = [24, 72], strides = [1, 1]} : vector<48x72xf32> to vector<24x72xf32>
    %cst_37 = arith.constant dense<0.000000e+00> : vector<24x8xf32>
    %90 = tpu.matmul %89, %88, %cst_37 {dimension_numbers = #tpu.dot_dimension_numbers<[1], [1], [0], [0], [0, 0, 1, 0], [], []>} : vector<24x72xf32>, vector<8x72xf32>, vector<24x8xf32> -> vector<24x8xf32>
    %91 = tpu.concatenate %79, %90 in 0 : vector<24x8xf32>, vector<24x8xf32> -> vector<48x8xf32>
    %cst_38 = arith.constant 1.702000e+00 : f32
    %92 = vector.broadcast %cst_38 : f32 to vector<48x8xf32>
    %93 = arith.mulf %92, %91 : vector<48x8xf32>
    %94 = arith.negf %93 : vector<48x8xf32>
    %95 = math.exp %94 : vector<48x8xf32>
    %cst_39 = arith.constant 1.000000e+00 : f32
    %96 = vector.broadcast %cst_39 : f32 to vector<48x8xf32>
    %97 = arith.addf %96, %95 : vector<48x8xf32>
    %98 = arith.divf %96, %97 : vector<48x8xf32>
    %99 = arith.mulf %91, %98 : vector<48x8xf32>
    %cst_40 = arith.constant dense<0.000000e+00> : vector<48x32xf32>
    %100 = tpu.matmul %99, %5, %cst_40 {dimension_numbers = #tpu.dot_dimension_numbers<[1], [0], [0], [1], [0, 0, 1, 1], [], []>} : vector<48x8xf32>, vector<8x32xf32>, vector<48x32xf32> -> vector<48x32xf32>
    %101 = vector.broadcast %9 : vector<1x32xf32> to vector<48x32xf32>
    %102 = arith.addf %100, %101 : vector<48x32xf32>
    %103 = arith.addf %0, %102 : vector<48x32xf32>
    %c0_41 = arith.constant 0 : index
    %c0_42 = arith.constant 0 : index
    %104 = vector.load %arg7[%c0_41, %c0_42] : memref<48x32xf32, #tpu.memory_space<vmem>>, vector<48x32xf32>
    tpu.vector_store %arg7[%c0_41, %c0_42], %103 {strides = array<i32>} : memref<48x32xf32, #tpu.memory_space<vmem>>, vector<48x32xf32>,
    return
  }
}

</mosaic_0001>

<bundles_post_ra>
// kernel: tpu_custom_call.1
= control target key start
LH: loop header
LB: loop body
LE: loop exit
PB: predicated region body
PF: predicated region fallthrough
CT: control target
= control target key end

     0   :  { %12 = vsyncpa [#allocation3], 0  ;;  %s3067_s0 = inlined_call_operand.vmem [shape: f32[48,32], index: 0, kind: input, shape index: {}]   ;;  %s3068_s1 = inlined_call_operand.vmem [shape: f32[100,64], index: 1, kind: input, shape index: {}]   ;;  %s3069_s2 = inlined_call_operand.vmem [shape: f32[40,32], index: 2, kind: input, shape index: {}]   ;;  %s3070_s3 = inlined_call_operand.vmem [shape: f32[64,576], index: 3, kind: input, shape index: {}]   ;;  %s3071_s4 = inlined_call_operand.hbm [shape: f32[8,576], index: 4, kind: input, shape index: {}]   ;;  %s3072_s5 = inlined_call_operand.hbm [shape: f32[48,72], index: 5, kind: input, shape index: {}]   ;;  %s3073_s6 = inlined_call_operand.vmem [shape: f32[2,48], index: 6, kind: input, shape index: {}]   ;;  %s3074_s7 = inlined_call_operand.vmem [shape: f32[48,32], index: 7, kind: output, shape index: {}]  }
   0x1   :  { %13 = vsyncpa [#allocation5], 0  ;;  %s2276_s24 = smov [#allocation2]   ;;  %s2277_s26 = smov [#allocation4]  }
   0x2   :  { %s28_s25 = sshll.u32 %s2276_s24, 4  ;;  %s37_s27 = sshll.u32 %s2277_s26, 4  ;;  %s29_s25 = int_to_ptr.vmem [resolvable:$true] %s28_s25  ;;  %s38_s27 = int_to_ptr.vmem [resolvable:$true] %s37_s27 }
   0x3   :  { %s2240_s28 = scalar_lea.vmem %s29_s25, 640  ;;  %p2245_p1 = scmp.lt.s32.totalorder %s29_s25, %s29_s25 }
   0x4   :  { %p2241_p0 = scmp.ne.s32.totalorder %s29_s25, %s2240_s28  ;;  %p2246_p2 = scmp.lt.s32.totalorder %s2240_s28, %s2240_s28 }
   0x6   :  { %p2247_p3 = por %p2246_p2, %p2245_p1 }
   0x8   :  { %p2248_p4 = pnand %p2247_p3, %p2241_p0 }
   0xa   :  { %2251 = shalt.err (!%p2248_p4)
}
   0xb   :  { %31 = dma.hbm_to_vmem [thread:$0]  %s3071_s4, 640, %s29_s25, [#allocation3]  }
   0xc   :  { %s2260_s8 = scalar_lea.vmem %s38_s27, 768  ;;  %p2265_p6 = scmp.lt.s32.totalorder %s38_s27, %s38_s27 }
   0xd   :  { %p2261_p5 = scmp.ne.s32.totalorder %s38_s27, %s2260_s8  ;;  %p2266_p7 = scmp.lt.s32.totalorder %s2260_s8, %s2260_s8 }
   0xf   :  { %p2267_p8 = por %p2266_p7, %p2265_p6 }
  0x11   :  { %p2268_p9 = pnand %p2267_p8, %p2261_p5 }
  0x13   :  { %2271 = shalt.err (!%p2268_p9)
}
  0x14   :  { %s2278_s9 = smov 128   ;;  %s2279_s10 = smov 8  }
  0x15   :  { %43 = dma.hbm_to_vmem [thread:$0]  %s3072_s5, 768, %s38_s27, [#allocation5], %s2278_s9, %s2278_s9, %s2279_s10  }
  0x16   :  { %2272 = dma.done.wait [#allocation3], 640  }
  0x17   :  { %2273 = vsyncadd [#allocation3], 4294966656 }
  0x18   :  { %2274 = dma.done.wait [#allocation5], 768  }
  0x19   :  { %2275 = vsyncadd [#allocation5], 4294966528  ;;  %vm91_vm0 = vcmask 261120   ;;  %v61_v0 = vld [vmem:[%s3068_s1 + $0x18] sm:$0xff]  ;;  %v60_v1 = vld [vmem:[%s3068_s1 + $0x10] sm:$0xff]  ;;  %vm211_vm1 = vcmask 523264  }
  0x1a   :  { %2007 = vmatprep.subr.mxu0 %v61_v0  ;;  %v52_v2 = vld [vmem:[%s3067_s0] sm:$0xff]  ;;  %v59_v3 = vld [vmem:[%s3068_s1 + $0x8] sm:$0xff]  ;;  %v69_v4 = vld [vmem:[%s3068_s1 + $0x58] sm:$0xff]  ;;  %v2280_v37 = vmov 0.0   ;;  %vm2281_vm2 = vmmov 0   ;;  %vm468_vm3 = vcmask 386048  }
  0x1b   :  { %2008 = vmatpush3.msra.mxu0 %v61_v0  ;;  %2015 = vmatprep.mubr.msk.f32.mxu0 %vm91_vm0, %v52_v2  ;;  %v68_v5 = vld [vmem:[%s3068_s1 + $0x50] sm:$0xff]  ;;  %v58_v6 = vld [vmem:[%s3068_s1] sm:$0xff]  ;;  %v67_v7 = vld [vmem:[%s3068_s1 + $0x48] sm:$0xff]  ;;  %vm569_vm4 = vcmask 388096   ;;  %vm576_vm5 = vcmask 392192   ;;  %s2284_s4 = smov 24  }
  0x1c   :  { %2009 = vmatprep.subr.mxu0 %v60_v1  ;;  %2024 = vmatprep.subr.mxu1 %v69_v4  ;;  %v2367_v8 = vld [vmem:[%s3067_s0 + $0x8] sm:$0xff]  ;;  %v2372_v9 = vld [vmem:[%s3067_s0 + $0x10] sm:$0xff]  ;;  %v66_v10 = vld [vmem:[%s3068_s1 + $0x40] sm:$0xff]  ;;  %s2285_s13 = smov 40   ;;  %s2286_s14 = smov 48   ;;  %vm1341_vm11 = vcmask 64512  }
  0x1d   :  { %2010 = vmatpush3.msra.mxu0 %v60_v1  ;;  %2025 = vmatpush3.msra.mxu1 %v69_v4  ;;  %v2384_v11 = vld [vmem:[%s3067_s0 + $0x18] sm:$0xff]  ;;  %v2389_v12 = vld [vmem:[%s3067_s0 + $0x20] sm:$0xff]  ;;  %v57_v13 = vld [vmem:[%s3067_s0 + $0x28] sm:$0xff]  ;;  %s2287_s15 = smov 56   ;;  %s2288_s16 = smov 64   ;;  %vm1348_vm12 = vcmask 130048  }
  0x1e   :  { %2011 = vmatprep.subr.mxu0 %v59_v3  ;;  %2026 = vmatprep.subr.mxu1 %v68_v5  ;;  %v65_v14 = vld [vmem:[%s3068_s1 + $0x38] sm:$0xff]  ;;  %v64_v15 = vld [vmem:[%s3068_s1 + $0x30] sm:$0xff]  ;;  %v63_v16 = vld [vmem:[%s3068_s1 + $0x28] sm:$0xff]  ;;  %vm1355_vm13 = vcmask 195584   ;;  %vm1368_vm14 = vcmask 326656   ;;  %vm1381_vm15 = vcmask 457728  }
  0x1f   :  { %2012 = vmatpush3.msra.mxu0 %v59_v3  ;;  %2027 = vmatpush3.msra.mxu1 %v68_v5  ;;  %v62_v17 = vld [vmem:[%s3068_s1 + $0x20] sm:$0xff]  ;;  %v74_v38 = vld [vmem:[%s3069_s2 + $0x18] sm:$0xff]  ;;  %v73_v39 = vld [vmem:[%s3069_s2 + $0x10] sm:$0xff]  ;;  %s2290_s17 = smov 112   ;;  %s2291_s5 = smov 80  }
  0x20   :  { %2013 = vmatprep.subr.mxu0 %v58_v6  ;;  %2028 = vmatprep.subr.mxu1 %v67_v7  ;;  %v76_v18 = vld [vmem:[#allocation2] ss:$0 sm:$0xff]  ;;  %v72_v40 = vld [vmem:[%s3069_s2 + $0x8] sm:$0xff]  ;;  %v77_v46 = vld [vmem:[#allocation2 + $0x1] ss:$0 sm:$0xff] }
  0x21   :  { %2014 = vmatpush3.msra.mxu0 %v58_v6  ;;  %2029 = vmatpush3.msra.mxu1 %v67_v7  ;;  %v71_v41 = vld [vmem:[%s3069_s2] sm:$0xff] }
  0x22   :  { %2016 = vmatmul.mubr.msk.f32.vlgmr.msra.gmra.mxu0 %vm91_vm0, %v2367_v8  ;;  %2030 = vmatprep.subr.mxu1 %v66_v10  ;;  %v70_v55 = vld [vmem:[%s3068_s1 + $0x60] sm:$0xf]  ;;  %s2282_s1 = smov 32  }
  0x23   :  { %2018 = vmatprep.mubr.msk.f32.mxu0 %vm91_vm0, %v2372_v9  ;;  %2031 = vmatpush3.msra.mxu1 %v66_v10  ;;  %v2482_v60 = vld [vmem:[%s3073_s6] sm:$0x3]  ;;  %v78_v61 = vld [vmem:[#allocation2 + $0x2] ss:$0 sm:$0xff]  ;;  %s2283_s6 = smov 16  }
  0x24   :  { %2032 = vmatprep.subr.mxu1 %v65_v14  ;;  %2049 = vmatprep.subr.mxu0 %v74_v38  ;;  %v469_v63 = vsel %vm468_vm3, %v2482_v60, 0.0  ;;  %vm658_vm3 = vcmask 1041408  }
  0x25   :  { %2033 = vmatpush3.msra.mxu1 %v65_v14  ;;  %2050 = vmatpush3.msra.mxu0 %v74_v38 }
  0x26   :  { %2019 = vmatmul.mubr.msk.f32.gmra.mxu0 %vm91_vm0, %v2384_v11  ;;  %2034 = vmatprep.subr.mxu1 %v64_v15 }
  0x27   :  { %2021 = vmatprep.mubr.msk.f32.mxu0 %vm91_vm0, %v2389_v12  ;;  %2035 = vmatpush3.msra.mxu1 %v64_v15 }
  0x28   :  { %2036 = vmatprep.subr.mxu1 %v63_v16  ;;  %2051 = vmatprep.subr.mxu0 %v73_v39 }
  0x29   :  { %2037 = vmatpush3.msra.mxu1 %v63_v16  ;;  %2052 = vmatpush3.msra.mxu0 %v73_v39 }
  0x2a   :  { %2022 = vmatmul.mubr.msk.f32.gmra.mxu0 %vm91_vm0, %v57_v13  ;;  %2038 = vmatprep.subr.mxu1 %v62_v17 }
  0x2b   :  { %2057 = vmatprep.mubr.msk.f32.mxu0 %vm91_vm0, %v52_v2  ;;  %2039 = vmatpush3.msra.mxu1 %v62_v17  ;;  %v470_v2 = vrot.slane %v469_v63, 4 }
  0x2c   :  { %2066 = vmatprep.subr.mxu1 %v2280_v37  ;;  %2053 = vmatprep.subr.mxu0 %v72_v40 }
  0x2d   :  { %2054 = vmatpush3.msra.mxu0 %v72_v40  ;;  %v471_v5 = vadd.f32 %v470_v2, %v469_v63 }
  0x2e   :  { %2055 = vmatprep.subr.mxu0 %v71_v41 }
  0x2f   :  { %2056 = vmatpush3.msra.mxu0 %v71_v41 }
  0x30   :  { %2058 = vmatmul.mubr.msk.f32.vlgmr.msra.gmra.mxu0 %vm91_vm0, %v2367_v8  ;;  %2081 = vmatprep.subr.mxu0 %v2280_v37  ;;  %v472_v8 = vrot.slane %v471_v5, 2 }
  0x31   :  { %2060 = vmatprep.mubr.msk.f32.mxu0 %vm91_vm0, %v2372_v9  ;;  %2082 = vmatpush3.xpose.msk.msra.mxu0 %vm576_vm5, %v2482_v60 }
  0x32   :  { %v473_v10 = vadd.f32 %v472_v8, %v471_v5  ;;  %2086 = vmatprep.subr.mxu0 %v2280_v37 }
  0x34   :  { %2061 = vmatmul.mubr.msk.f32.gmra.mxu0 %vm91_vm0, %v2384_v11  ;;  %v474_v14 = vrot.slane %v473_v10, 1 }
  0x35   :  { %2063 = vmatprep.mubr.msk.f32.mxu0 %vm91_vm0, %v2389_v12 }
  0x38   :  { %2064 = vmatmul.mubr.msk.f32.gmra.mxu0 %vm91_vm0, %v57_v13 }
  0x39   :  { %2083 = vmatprep.mubr.msk.f32.mxu0 %vm2281_vm2, %v2280_v37 }
  0xe2   :  { %v2017_v19 = vpop.f32.mrf.mxu0 }
  0xe3   :  { %v182_v20 = vadd.f32 %v2017_v19, %v76_v18 }
  0xe4   :  { %v176_v21 = vpop.f32.mrf.mxu0 }
  0xe5   :  { %v177_v22 = vadd.f32 %v176_v21, %v76_v18  ;;  %v206_v25 = vmax.f32 %v182_v20, 0.0 }
  0xe6   :  { %v2020_v23 = vpop.f32.mrf.mxu0 }
  0xe7   :  { %v205_v24 = vmax.f32 %v177_v22, 0.0  ;;  %v192_v26 = vadd.f32 %v2020_v23, %v76_v18 }
  0xe8   :  { %v186_v27 = vpop.f32.mrf.mxu0 }
  0xe9   :  { %v187_v28 = vadd.f32 %v186_v27, %v76_v18  ;;  %2040 = vmatprep.mubr.msk.f32.mxu1 %vm211_vm1, %v205_v24  ;;  %v208_v31 = vmax.f32 %v192_v26, 0.0 }
  0xea   :  { %v2023_v29 = vpop.f32.mrf.mxu0  ;;  %2041 = vmatmul.mubr.msk.f32.vlgmr.msra.gmra.mxu1 %vm211_vm1, %v206_v25 }
  0xeb   :  { %v207_v30 = vmax.f32 %v187_v28, 0.0  ;;  %v202_v32 = vadd.f32 %v2023_v29, %v76_v18 }
  0xec   :  { %v196_v33 = vpop.f32.mrf.mxu0 }
  0xed   :  { %v197_v34 = vadd.f32 %v196_v33, %v76_v18  ;;  %2043 = vmatprep.mubr.msk.f32.mxu1 %vm211_vm1, %v207_v30  ;;  %v210_v36 = vmax.f32 %v202_v32, 0.0  ;;  %v475_v18 = vadd.f32 %v474_v14, %v473_v10 }
  0xee   :  { %2044 = vmatmul.mubr.msk.f32.gmra.mxu1 %vm211_vm1, %v208_v31 }
  0xef   :  { %v209_v35 = vmax.f32 %v197_v34, 0.0  ;;  %v1895_v23 = vadd.f32 -1.0, %v475_v18 }
  0xf0   :  { %v2059_v56 = vpop.f32.mrf.mxu0 }
  0xf1   :  { %2046 = vmatprep.mubr.msk.f32.mxu1 %vm211_vm1, %v209_v35  ;;  %v397_v9 = vadd.f32 %v2059_v56, %v78_v61  ;;  %v477_v26 = vmul.f32 1e+30, %v1895_v23 }
  0xf2   :  { %2047 = vmatmul.mubr.msk.f32.gmra.mxu1 %vm211_vm1, %v210_v36  ;;  %v391_v57 = vpop.f32.mrf.mxu0 }
  0xf3   :  { %2078 = vmatprep.mubr.msk.f32.mxu1 %vm2281_vm2, %v2280_v37  ;;  %v392_v0 = vadd.f32 %v391_v57, %v78_v61  ;;  %v1890_v13 = vmul.f32 -1.702, %v397_v9 }
  0xf4   :  { %v2062_v58 = vpop.f32.mrf.mxu0 }
  0xf5   :  { %v1889_v3 = vmul.f32 -1.702, %v392_v0  ;;  %v407_v11 = vadd.f32 %v2062_v58, %v78_v61  ;;  %v434_v17 = vmul.f32 1.442695, %v1890_v13 }
  0xf6   :  { %v401_v59 = vpop.f32.mrf.mxu0 }
  0xf7   :  { %v432_v6 = vmul.f32 1.442695, %v1889_v3  ;;  %v402_v12 = vadd.f32 %v401_v59, %v78_v61  ;;  %v1892_v15 = vmul.f32 -1.702, %v407_v11 }
  0xf8   :  { %v2065_v62 = vpop.f32.mrf.mxu0 }
  0xf9   :  { %v417_v1 = vadd.f32 %v2065_v62, %v78_v61  ;;  %2174 = vpow2.f32 %v432_v6  ;;  %v1891_v16 = vmul.f32 -1.702, %v402_v12  ;;  %v438_v19 = vmul.f32 1.442695, %v1892_v15 }
  0xfb   :  { %v1894_v4 = vmul.f32 -1.702, %v417_v1  ;;  %v436_v20 = vmul.f32 1.442695, %v1891_v16 }
  0xfd   :  { %v442_v7 = vmul.f32 1.442695, %v1894_v4 }
  0xff   :  { %2176 = vpow2.f32 %v442_v7 }
 0x100   :  { %2178 = vpow2.f32 %v434_v17 }
 0x101   :  { %2180 = vpow2.f32 %v438_v19 }
 0x102   :  { %2182 = vpow2.f32 %v436_v20 }
 0x106   :  { %v2175_v21 = vpop.eup %2174 }
 0x107   :  { %v444_v24 = vadd.f32 1.0, %v2175_v21 }
 0x109   :  { %2184 = vrcp.f32 %v444_v24 }
 0x10c   :  { %v2177_v22 = vpop.eup %2176 }
 0x10d   :  { %v449_v25 = vadd.f32 1.0, %v2177_v22  ;;  %v2179_v31 = vpop.eup %2178 }
 0x10e   :  { %v2181_v32 = vpop.eup %2180  ;;  %v445_v34 = vadd.f32 1.0, %v2179_v31 }
 0x10f   :  { %2186 = vrcp.f32 %v449_v25  ;;  %v2183_v33 = vpop.eup %2182  ;;  %v447_v35 = vadd.f32 1.0, %v2181_v32 }
 0x110   :  { %v446_v36 = vadd.f32 1.0, %v2183_v33  ;;  %2188 = vrcp.f32 %v445_v34 }
 0x111   :  { %2190 = vrcp.f32 %v447_v35 }
 0x112   :  { %2192 = vrcp.f32 %v446_v36 }
 0x116   :  { %v2185_v38 = vpop.eup %2184 }
 0x117   :  { %v2489_v40 = vmul.f32 %v2185_v38, %v392_v0 }
 0x119   :  { %v1122_v0 = vrot.slane %v2489_v40, 5  ;;  %v1135_v3 = vrot.slane %v2489_v40, 7  ;;  %v1148_v10 = vrot.slane %v2489_v40, 1  ;;  %v1094_v14 = vrot.slane %v2489_v40, 3 }
 0x11c   :  { %v2187_v39 = vpop.eup %2186 }
 0x11d   :  { %v2491_v41 = vmul.f32 %v2187_v39, %v417_v1  ;;  %v2189_v57 = vpop.eup %2188 }
 0x11e   :  { %v2191_v58 = vpop.eup %2190 }
 0x11f   :  { %v2193_v59 = vpop.eup %2192  ;;  %v2514_v62 = vmul.f32 %v2191_v58, %v407_v11  ;;  %v1127_v1 = vrot.slane %v2491_v41, 5  ;;  %v1140_v4 = vrot.slane %v2491_v41, 7  ;;  %v1099_v22 = vrot.slane %v2491_v41, 3 }
 0x120   :  { %v2516_v63 = vmul.f32 %v2193_v59, %v402_v12 }
 0x121   :  { %v1112_v8 = vrot.slane %v2514_v62, 4  ;;  %v1125_v21 = vrot.slane %v2514_v62, 5 }
 0x122   :  { %v1111_v7 = vrot.slane %v2516_v63, 4  ;;  %v1124_v20 = vrot.slane %v2516_v63, 5  ;;  %v1150_v35 = vrot.slane %v2516_v63, 1  ;;  %v1096_v58 = vrot.slane %v2516_v63, 3 }
 0x1aa   :  { %v2042_v42 = vpop.f32.mrf.mxu1 }
 0x1ab   :  { %v2465_v53 = vadd.f32 %v2042_v42, %v77_v46  ;;  %v411_v42 = vpop.f32.mrf.mxu0 }
 0x1ac   :  { %v296_v43 = vpop.f32.mrf.mxu1 }
 0x1ad   :  { %v2470_v54 = vadd.f32 %v296_v43, %v77_v46  ;;  %v854_v43 = vlaneseq }
 0x1ae   :  { %v2045_v44 = vpop.f32.mrf.mxu1 }
 0x1af   :  { %v2455_v51 = vadd.f32 %v2045_v44, %v77_v46  ;;  %v2495_v44 = vadd.f32 %v411_v42, %v78_v61  ;;  %v2512_v61 = vmul.f32 %v2189_v57, %v397_v9 }
 0x1b0   :  { %v306_v45 = vpop.f32.mrf.mxu1 }
 0x1b1   :  { %v2460_v52 = vadd.f32 %v306_v45, %v77_v46  ;;  %v1109_v45 = vrot.slane %v2489_v40, 4  ;;  %v1110_v2 = vrot.slane %v2512_v61, 4  ;;  %v1149_v11 = vrot.slane %v2512_v61, 1 }
 0x1b2   :  { %v2048_v47 = vpop.f32.mrf.mxu1  ;;  %v1095_v15 = vrot.slane %v2512_v61, 3  ;;  %v1123_v18 = vrot.slane %v2512_v61, 5  ;;  %v1136_v24 = vrot.slane %v2512_v61, 7 }
 0x1b3   :  { %v2445_v48 = vadd.f32 %v2048_v47, %v77_v46  ;;  %v2499_v47 = vshrl.u32 %v854_v43, 7 }
 0x1b4   :  { %v316_v49 = vpop.f32.mrf.mxu1 }
 0x1b5   :  { %2067 = vmatpush3.xpose.msk.msra.mxu1 %vm211_vm1, %v2445_v48  ;;  %v2450_v50 = vadd.f32 %v316_v49, %v77_v46  ;;  %v1114_v46 = vrot.slane %v2491_v41, 4  ;;  %v1893_v49 = vmul.f32 -1.702, %v2495_v44  ;;  %vm1115_vm6 = vcmp.lt.s32.totalorder %v2499_v47, 4 }
 0x1b6   :  { %2068 = vmatprep.subr.mxu1 %v2280_v37  ;;  %vm1128_vm7 = vcmp.lt.s32.totalorder %v2499_v47, 3  ;;  %vm1141_vm8 = vcmp.lt.s32.totalorder %v2499_v47, 1  ;;  %v1120_v6 = vsel %vm1115_vm6, %v1109_v45, %v1110_v2  ;;  %vm1154_vm9 = vcmp.lt.s32.totalorder %v2499_v47, 7 }
 0x1b7   :  { %v2508_v56 = vsel %vm1115_vm6, %v1114_v46, %v1109_v45  ;;  %v2531_v5 = vsel %vm1128_vm7, %v1127_v1, %v1122_v0  ;;  %v1147_v9 = vsel %vm1141_vm8, %v1140_v4, %v1135_v3  ;;  %v2547_v13 = vsel %vm1115_vm6, %v1111_v7, %v1112_v8 }
 0x1b8   :  { %1167 = vrot.lane.b32.xlu1 %v2508_v56, %s2279_s10  ;;  %vm1102_vm10 = vcmp.lt.s32.totalorder %v2499_v47, 5  ;;  %v1159_v17 = vsel %vm1154_vm9, %v1148_v10, %v1149_v11  ;;  %v1133_v23 = vsel %vm1128_vm7, %v1122_v0, %v1123_v18  ;;  %v1119_v34 = vsel %vm1115_vm6, %v1110_v2, %v1111_v7 }
 0x1b9   :  { %2069 = vmatpush3.xpose.msk.msra.mxu1 %vm211_vm1, %v2450_v50  ;;  %v2562_v19 = vsel %vm1102_vm10, %v1094_v14, %v1095_v15  ;;  %v2575_v25 = vsel %vm1102_vm10, %v1099_v22, %v1094_v14  ;;  %v1158_v42 = vsel %vm1154_vm9, %v1149_v11, %v1150_v35  ;;  %v1132_v57 = vsel %vm1128_vm7, %v1123_v18, %v1124_v20 }
 0x1ba   :  { %2070 = vmatprep.subr.mxu1 %v2280_v37  ;;  %v1153_v7 = vrot.slane %v2491_v41, 1 }
 0x1bc   :  { %1191 = vrot.lane.b32.xlu1 %v2531_v5, %s2283_s6 }
 0x1bd   :  { %2071 = vmatpush3.xpose.msk.msra.mxu1 %vm211_vm1, %v2455_v51 }
 0x1be   :  { %2072 = vmatprep.subr.mxu1 %v2280_v37 }
 0x1c0   :  { %1215 = vrot.lane.b32.xlu1 %v1147_v9, %s2284_s4 }
 0x1c1   :  { %2073 = vmatpush3.xpose.msk.msra.mxu1 %vm211_vm1, %v2460_v52 }
 0x1c2   :  { %2074 = vmatprep.subr.mxu1 %v2280_v37 }
 0x1c4   :  { %1263 = vrot.lane.b32.xlu1 %v1159_v17, %s2285_s13 }
 0x1c5   :  { %2075 = vmatpush3.xpose.msk.msra.mxu1 %vm211_vm1, %v2465_v53 }
 0x1c6   :  { %2076 = vmatprep.subr.mxu1 %v2280_v37 }
 0x1c8   :  { %1193 = vrot.lane.b32.xlu1 %v1133_v23, %s2283_s6 }
 0x1c9   :  { %2077 = vmatpush3.xpose.msk.msra.mxu1 %vm211_vm1, %v2470_v54 }
 0x1cc   :  { %2079 = vmatmul.mubr.msk.f32.vlgmr.msra.gmra.mxu1 %vm211_vm1, %v70_v55  ;;  %v440_v55 = vmul.f32 1.442695, %v1893_v49 }
 0x1cd   :  { %946 = vmatprep.mubr.f32.mxu1 %v2280_v37 }
 0x1ce   :  { %2194 = vpow2.f32 %v440_v55  ;;  %v1151_v55 = vrot.slane %v2514_v62, 1 }
 0x1db   :  { %v2195_v12 = vpop.eup %2194 }
 0x1dc   :  { %v448_v16 = vadd.f32 1.0, %v2195_v12 }
 0x1de   :  { %2196 = vrcp.f32 %v448_v16 }
 0x1eb   :  { %v2197_v31 = vpop.eup %2196 }
 0x1ec   :  { %v466_v33 = vmul.f32 %v2197_v31, %v2495_v44 }
 0x1ee   :  { %v1113_v36 = vrot.slane %v466_v33, 4  ;;  %v1126_v38 = vrot.slane %v466_v33, 5  ;;  %v1139_v39 = vrot.slane %v466_v33, 7  ;;  %v1098_v2 = vrot.slane %v466_v33, 3 }
 0x1f0   :  { %v1116_v43 = vsel %vm1115_vm6, %v1113_v36, %v1114_v46  ;;  %v2613_v44 = vsel %vm1128_vm7, %v1126_v38, %v1127_v1  ;;  %v1142_v45 = vsel %vm1141_vm8, %v1139_v39, %v1140_v4  ;;  %v1117_v49 = vsel %vm1115_vm6, %v1112_v8, %v1113_v36 }
 0x1f1   :  { %v1152_v46 = vrot.slane %v466_v33, 1  ;;  %v1130_v0 = vsel %vm1128_vm7, %v1125_v21, %v1126_v38  ;;  %v1097_v1 = vrot.slane %v2514_v62, 3  ;;  %v2676_v9 = vsel %vm1102_vm10, %v1098_v2, %v1099_v22 }
 0x1f2   :  { %vm654_vm6 = vcmask 15360  }
 0x1f3   :  { %v1156_v59 = vsel %vm1154_vm9, %v1151_v55, %v1152_v46  ;;  %v2645_v4 = vsel %vm1102_vm10, %v1097_v1, %v1098_v2  ;;  %v1155_v8 = vsel %vm1154_vm9, %v1152_v46, %v1153_v7 }
 0x22a   :  { %v1168_v14 = vpop.permute.xlu1 %1167 }
 0x22b   :  { %v1342_v16 = vsel %vm1341_vm11, %v2575_v25, %v1168_v14 }
 0x22e   :  { %v1192_v18 = vpop.permute.xlu1 %1191 }
 0x28c   :  { %v565_v27 = vpop.f32.mrf.mxu1 }
 0x28d   :  { %v2485_v28 = vadd.f32 %v565_v27, %v477_v26  ;;  %v2581_v26 = vsel %vm1128_vm7, %v1124_v20, %v1125_v21  ;;  %v1146_v27 = vsel %vm1141_vm8, %v1135_v3, %v1136_v24  ;;  %v1216_v21 = vpop.permute.xlu1 %1215  ;;  %vm1452_vm7 = vcmask 1042432  }
 0x28e   :  { %v2080_v29 = vpop.f32.mrf.mxu1  ;;  %1217 = vrot.lane.b32.xlu1 %v1146_v27, %s2284_s4 }
 0x28f   :  { %v570_v30 = vsel %vm569_vm4, %v2485_v28, -inf  ;;  %v1137_v29 = vrot.slane %v2516_v63, 7 }
 0x290   :  { %571 = vmax.xlane.f32.xlu0 %v570_v30  ;;  %v1138_v30 = vrot.slane %v2514_v62, 7 }
 0x291   :  { %v1145_v3 = vsel %vm1141_vm8, %v1136_v24, %v1137_v29 }
 0x292   :  { %v1144_v32 = vsel %vm1141_vm8, %v1137_v29, %v1138_v30  ;;  %1241 = vrot.lane.b32.xlu1 %v2512_v61, %s2282_s1  ;;  %v2632_v61 = vsel %vm1102_vm10, %v1095_v15, %v1096_v58 }
 0x296   :  { %1171 = vrot.lane.b32.xlu1 %v1119_v34, %s2279_s10 }
 0x29a   :  { %1265 = vrot.lane.b32.xlu1 %v1158_v42, %s2285_s13 }
 0x29e   :  { %1175 = vrot.lane.b32.xlu1 %v1117_v49, %s2279_s10 }
 0x2a2   :  { %1269 = vrot.lane.b32.xlu1 %v1156_v59, %s2285_s13 }
 0x2a6   :  { %1239 = vrot.lane.b32.xlu0 %v2489_v40, %s2282_s1  ;;  %1199 = vrot.lane.b32.xlu1 %v1130_v0, %s2283_s6 }
 0x2aa   :  { %1169 = vrot.lane.b32.xlu0 %v1120_v6, %s2279_s10  ;;  %1293 = vrot.lane.b32.xlu1 %v2645_v4, %s2286_s14 }
 0x2ae   :  { %1173 = vrot.lane.b32.xlu0 %v2547_v13, %s2279_s10  ;;  %1243 = vrot.lane.b32.xlu1 %v2516_v63, %s2282_s1  ;;  %v1105_v63 = vsel %vm1102_vm10, %v1096_v58, %v1097_v1  ;;  %vm1458_vm10 = vcmask 1045504  }
 0x2b2   :  { %1287 = vrot.lane.b32.xlu0 %v2562_v19, %s2286_s14  ;;  %1325 = vrot.lane.b32.xlu1 %v1132_v57, %s2288_s16 }
 0x2b6   :  { %1197 = vrot.lane.b32.xlu0 %v2581_v26, %s2283_s6 }
 0x2ba   :  { %1305 = vrot.lane.b32.xlu0 %v1120_v6, %s2287_s15  ;;  %v1157_v6 = vsel %vm1154_vm9, %v1150_v35, %v1151_v55 }
 0x2bb   :  { %1267 = vrot.lane.b32.xlu1 %v1157_v6, %s2285_s13 }
 0x2be   :  { %1221 = vrot.lane.b32.xlu0 %v1144_v32, %s2284_s4 }
 0x2bf   :  { %1177 = vrot.lane.b32.xlu1 %v1116_v43, %s2279_s10 }
 0x2c2   :  { %1323 = vrot.lane.b32.xlu0 %v1133_v23, %s2288_s16 }
 0x2c3   :  { %1291 = vrot.lane.b32.xlu1 %v1105_v63, %s2286_s14 }
 0x2c6   :  { %1245 = vrot.lane.b32.xlu0 %v2514_v62, %s2282_s1  ;;  %v1143_v62 = vsel %vm1141_vm8, %v1138_v30, %v1139_v39  ;;  %vm1454_vm8 = vcmask 1043456  }
 0x2c7   :  { %1295 = vrot.lane.b32.xlu1 %v2676_v9, %s2286_s14 }
 0x2ca   :  { %1195 = vrot.lane.b32.xlu0 %v1132_v57, %s2283_s6 }
 0x2cb   :  { %1225 = vrot.lane.b32.xlu1 %v1142_v45, %s2284_s4 }
 0x2ce   :  { %1289 = vrot.lane.b32.xlu0 %v2632_v61, %s2286_s14 }
 0x2cf   :  { %1327 = vrot.lane.b32.xlu1 %v2581_v26, %s2288_s16  ;;  %v1264_v26 = vpop.permute.xlu1 %1263 }
 0x2d2   :  { %1219 = vrot.lane.b32.xlu0 %v1145_v3, %s2284_s4 }
 0x2d6   :  { %1307 = vrot.lane.b32.xlu0 %v1119_v34, %s2287_s15 }
 0x2da   :  { %1223 = vrot.lane.b32.xlu0 %v1143_v62, %s2284_s4 }
 0x2de   :  { %1311 = vrot.lane.b32.xlu0 %v1117_v49, %s2287_s15 }
 0x2e2   :  { %1247 = vrot.lane.b32.xlu0 %v466_v33, %s2282_s1  ;;  %v1194_v33 = vpop.permute.xlu1 %1193 }
 0x2e6   :  { %1329 = vrot.lane.b32.xlu0 %v1130_v0, %s2288_s16 }
 0x2ea   :  { %1271 = vrot.lane.b32.xlu0 %v1155_v8, %s2285_s13 }
 0x2ee   :  { %1201 = vrot.lane.b32.xlu0 %v2613_v44, %s2283_s6 }
 0x2f2   :  { %1309 = vrot.lane.b32.xlu0 %v2547_v13, %s2287_s15  ;;  %v1349_v13 = vsel %vm1348_vm12, %v1342_v16, %v1192_v18 }
 0x2f3   :  { %v1356_v22 = vsel %vm1355_vm13, %v1349_v13, %v1216_v21 }
 0x2f6   :  { %1313 = vrot.lane.b32.xlu0 %v1116_v43, %s2287_s15 }
 0x300   :  { %v1218_v38 = vpop.permute.xlu1 %1217 }
 0x304   :  { %v1242_v43 = vpop.permute.xlu1 %1241 }
 0x308   :  { %v1172_v46 = vpop.permute.xlu1 %1171 }
 0x309   :  { %v1344_v3 = vsel %vm1341_vm11, %v2632_v61, %v1172_v46 }
 0x30c   :  { %v1266_v59 = vpop.permute.xlu1 %1265 }
 0x310   :  { %v1176_v62 = vpop.permute.xlu1 %1175 }
 0x314   :  { %v1270_v8 = vpop.permute.xlu1 %1269 }
 0x318   :  { %v1200_v16 = vpop.permute.xlu1 %1199 }
 0x319   :  { %v572_v11 = vpop.xlane.xlu0 %571 }
 0x31a   :  { %v573_v12 = vsub.f32 %v2485_v28, %v572_v11 }
 0x31c   :  { %v574_v15 = vmul.f32 1.442695, %v573_v12  ;;  %v1346_v12 = vsel %vm1341_vm11, %v2645_v4, %v1176_v62  ;;  %v1294_v61 = vpop.permute.xlu1 %1293  ;;  %v833_v62 = vld [vmem:[%s3070_s3 + $0xa0] sm:$0xff] }
 0x31d   :  { %v1240_v17 = vpop.permute.xlu0 %1239 }
 0x31e   :  { %2198 = vpow2.f32 %v574_v15  ;;  %v1362_v28 = vsel %vm91_vm0, %v1356_v22, %v1240_v17  ;;  %v1353_v17 = vsel %vm1348_vm12, %v1346_v12, %v1200_v16  ;;  %v819_v12 = vld [vmem:[%s3070_s3 + $0x30] sm:$0xff]  ;;  %v813_v16 = vld [vmem:[%s3070_s3] sm:$0xff] }
 0x31f   :  { %v1369_v27 = vsel %vm1368_vm14, %v1362_v28, %v1264_v26 }
 0x321   :  { %v1170_v20 = vpop.permute.xlu0 %1169 }
 0x322   :  { %v1343_v30 = vsel %vm1341_vm11, %v2562_v19, %v1170_v20 }
 0x323   :  { %v1350_v34 = vsel %vm1348_vm12, %v1343_v30, %v1194_v33 }
 0x324   :  { %v1357_v39 = vsel %vm1355_vm13, %v1350_v34, %v1218_v38 }
 0x325   :  { %v1174_v23 = vpop.permute.xlu0 %1173  ;;  %v1363_v45 = vsel %vm91_vm0, %v1357_v39, %v1242_v43 }
 0x326   :  { %v1345_v24 = vsel %vm1341_vm11, %v1105_v63, %v1174_v23  ;;  %v1370_v0 = vsel %vm1368_vm14, %v1363_v45, %v1266_v59  ;;  %v1244_v23 = vpop.permute.xlu1 %1243 }
 0x329   :  { %v1288_v31 = vpop.permute.xlu0 %1287 }
 0x32a   :  { %v1375_v32 = vsel %vm576_vm5, %v1369_v27, %v1288_v31 }
 0x32b   :  { %v2697_v29 = vpop.eup %2198 }
 0x32c   :  { %2084 = vmatmul.mubr.msk.f32.vlgmr.msra.gmra.mxu0 %vm576_vm5, %v2697_v29 }
 0x32d   :  { %2088 = vmatprep.mubr.msk.f32.mxu0 %vm2281_vm2, %v2280_v37  ;;  %v1198_v35 = vpop.permute.xlu0 %1197  ;;  %2087 = vmatpush3.msk.msra.mxu0 %vm658_vm3, %v2482_v60 }
 0x32e   :  { %v1352_v36 = vsel %vm1348_vm12, %v1345_v24, %v1198_v35  ;;  %v1326_v24 = vpop.permute.xlu1 %1325  ;;  %2091 = vmatprep.subr.mxu0 %v2280_v37 }
 0x331   :  { %v1306_v19 = vpop.permute.xlu0 %1305 }
 0x332   :  { %v1382_v42 = vsel %vm1381_vm15, %v1375_v32, %v1306_v19  ;;  %v1268_v30 = vpop.permute.xlu1 %1267 }
 0x335   :  { %v1222_v49 = vpop.permute.xlu0 %1221 }
 0x336   :  { %v1359_v55 = vsel %vm1355_vm13, %v1352_v36, %v1222_v49  ;;  %v1178_v33 = vpop.permute.xlu1 %1177 }
 0x337   :  { %v1347_v43 = vsel %vm1341_vm11, %v2676_v9, %v1178_v33  ;;  %v841_v33 = vld [vmem:[%s3070_s3 + $0xe0] sm:$0xff] }
 0x339   :  { %v1324_v57 = vpop.permute.xlu0 %1323 }
 0x33a   :  { %v2713_v58 = vsel %vm211_vm1, %v1382_v42, %v1324_v57  ;;  %v1292_v38 = vpop.permute.xlu1 %1291 }
 0x33d   :  { %v1246_v1 = vpop.permute.xlu0 %1245 }
 0x33e   :  { %v1365_v2 = vsel %vm91_vm0, %v1359_v55, %v1246_v1  ;;  %v1296_v45 = vpop.permute.xlu1 %1295 }
 0x33f   :  { %v1372_v11 = vsel %vm1368_vm14, %v1365_v2, %v1270_v8  ;;  %v838_v2 = vld [vmem:[%s3070_s3 + $0xc8] sm:$0xff]  ;;  %v824_v8 = vld [vmem:[%s3070_s3 + $0x58] sm:$0xff] }
 0x340   :  { %v2727_v20 = vsel %vm576_vm5, %v1372_v11, %v1294_v61  ;;  %v823_v11 = vld [vmem:[%s3070_s3 + $0x50] sm:$0xff] }
 0x341   :  { %v1196_v6 = vpop.permute.xlu0 %1195 }
 0x342   :  { %v1351_v63 = vsel %vm1348_vm12, %v1344_v3, %v1196_v6  ;;  %v1226_v57 = vpop.permute.xlu1 %1225  ;;  %v834_v3 = vld [vmem:[%s3070_s3 + $0xa8] sm:$0xff]  ;;  %v829_v6 = vld [vmem:[%s3070_s3 + $0x80] sm:$0xff] }
 0x345   :  { %v1290_v14 = vpop.permute.xlu0 %1289 }
 0x346   :  { %v1376_v15 = vsel %vm576_vm5, %v1370_v0, %v1290_v14  ;;  %v818_v14 = vld [vmem:[%s3070_s3 + $0x28] sm:$0xff] }
 0x349   :  { %v1220_v18 = vpop.permute.xlu0 %1219 }
 0x34a   :  { %v1358_v13 = vsel %vm1355_vm13, %v1351_v63, %v1220_v18  ;;  %v828_v63 = vld [vmem:[%s3070_s3 + $0x78] sm:$0xff] }
 0x34b   :  { %v1364_v28 = vsel %vm91_vm0, %v1358_v13, %v1244_v23 }
 0x34c   :  { %v1371_v31 = vsel %vm1368_vm14, %v1364_v28, %v1268_v30 }
 0x34d   :  { %v1308_v21 = vpop.permute.xlu0 %1307  ;;  %v2742_v39 = vsel %vm576_vm5, %v1371_v31, %v1292_v38  ;;  %v850_v31 = vld [vmem:[%s3070_s3 + $0x128] sm:$0xff]  ;;  %v831_v38 = vld [vmem:[%s3070_s3 + $0x90] sm:$0xff] }
 0x34e   :  { %v1383_v22 = vsel %vm1381_vm15, %v1376_v15, %v1308_v21  ;;  %v814_v15 = vld [vmem:[%s3070_s3 + $0x8] sm:$0xff] }
 0x34f   :  { %v2732_v26 = vsel %vm211_vm1, %v1383_v22, %v1326_v24 }
 0x351   :  { %v1224_v4 = vpop.permute.xlu0 %1223 }
 0x352   :  { %v1360_v34 = vsel %vm1355_vm13, %v1353_v17, %v1224_v4 }
 0x355   :  { %v2734_v27 = vpop.permute.xlu0 %1311 }
 0x359   :  { %v1248_v32 = vpop.permute.xlu0 %1247 }
 0x35a   :  { %v1366_v36 = vsel %vm91_vm0, %v1360_v34, %v1248_v32  ;;  %v846_v32 = vld [vmem:[%s3070_s3 + $0x108] sm:$0xff]  ;;  %v836_v34 = vld [vmem:[%s3070_s3 + $0xb8] sm:$0xff] }
 0x35d   :  { %v2738_v35 = vpop.permute.xlu0 %1329 }
 0x361   :  { %v1272_v19 = vpop.permute.xlu0 %1271 }
 0x362   :  { %v1373_v42 = vsel %vm1368_vm14, %v1366_v36, %v1272_v19  ;;  %v835_v36 = vld [vmem:[%s3070_s3 + $0xb0] sm:$0xff]  ;;  %v830_v19 = vld [vmem:[%s3070_s3 + $0x88] sm:$0xff] }
 0x363   :  { %v2748_v49 = vsel %vm576_vm5, %v1373_v42, %v1296_v45  ;;  %v826_v42 = vld [vmem:[%s3070_s3 + $0x68] sm:$0xff]  ;;  %v821_v45 = vld [vmem:[%s3070_s3 + $0x40] sm:$0xff] }
 0x365   :  { %v1202_v55 = vpop.permute.xlu0 %1201 }
 0x366   :  { %v1354_v46 = vsel %vm1348_vm12, %v1347_v43, %v1202_v55  ;;  %v825_v43 = vld [vmem:[%s3070_s3 + $0x60] sm:$0xff]  ;;  %v820_v55 = vld [vmem:[%s3070_s3 + $0x38] sm:$0xff]  ;;  %vm1460_vm12 = vcmask 1046528  }
 0x367   :  { %v2752_v59 = vsel %vm1355_vm13, %v1354_v46, %v1226_v57  ;;  %v816_v46 = vld [vmem:[%s3070_s3 + $0x18] sm:$0xff]  ;;  %v815_v57 = vld [vmem:[%s3070_s3 + $0x10] sm:$0xff] }
 0x3ec   :  { %v649_v0 = vpop.f32.mrf.mxu0 }
 0x3ed   :  { %2200 = vrcp.f32 %v649_v0  ;;  %v852_v0 = vld [vmem:[%s3070_s3 + $0x138] sm:$0xff] }
 0x3ee   :  { %v2085_v9 = vpop.f32.mrf.mxu0 }
 0x3fa   :  { %v2201_v1 = vpop.eup %2200 }
 0x3fb   :  { %2089 = vmatmul.mubr.msk.f32.vlgmr.msra.gmra.mxu0 %vm654_vm6, %v2201_v1  ;;  %v847_v1 = vld [vmem:[%s3070_s3 + $0x110] sm:$0xff]  ;;  %vm1462_vm6 = vcmask 588800  }
 0x3fc   :  { %2092 = vmatpush3.msra.mxu0 %v2445_v48  ;;  %2103 = vmatprep.mubr.msk.f32.mxu0 %vm2281_vm2, %v2280_v37  ;;  %v849_v48 = vld [vmem:[%s3070_s3 + $0x120] sm:$0xff] }
 0x3fd   :  { %2093 = vmatprep.subr.mxu0 %v2280_v37  ;;  %898 = vmatprep.subr.mxu1 %v849_v48 }
 0x3fe   :  { %2094 = vmatpush3.msra.mxu0 %v2450_v50  ;;  %v848_v50 = vld [vmem:[%s3070_s3 + $0x118] sm:$0xff] }
 0x3ff   :  { %2095 = vmatprep.subr.mxu0 %v2280_v37  ;;  %899 = vmatpush1.msra.mxu1 %v848_v50  ;;  %v842_v50 = vld [vmem:[%s3070_s3 + $0xe8] sm:$0xff] }
 0x400   :  { %2096 = vmatpush3.msra.mxu0 %v2455_v51  ;;  %v851_v51 = vld [vmem:[%s3070_s3 + $0x130] sm:$0xff] }
 0x401   :  { %2097 = vmatprep.subr.mxu0 %v2280_v37 }
 0x402   :  { %2098 = vmatpush3.msra.mxu0 %v2460_v52  ;;  %v844_v52 = vld [vmem:[%s3070_s3 + $0xf8] sm:$0xff] }
 0x403   :  { %2099 = vmatprep.subr.mxu0 %v2280_v37  ;;  %900 = vmatprep.subr.mxu1 %v844_v52  ;;  %v832_v52 = vld [vmem:[%s3070_s3 + $0x98] sm:$0xff] }
 0x404   :  { %2100 = vmatpush3.msra.mxu0 %v2465_v53  ;;  %v843_v53 = vld [vmem:[%s3070_s3 + $0xf0] sm:$0xff] }
 0x405   :  { %2101 = vmatprep.subr.mxu0 %v2280_v37  ;;  %901 = vmatpush1.msra.mxu1 %v843_v53  ;;  %v827_v53 = vld [vmem:[%s3070_s3 + $0x70] sm:$0xff] }
 0x406   :  { %2102 = vmatpush3.msra.mxu0 %v2470_v54  ;;  %v839_v54 = vld [vmem:[%s3070_s3 + $0xd0] sm:$0xff] }
 0x407   :  { %969 = vmatprep.subr.mxu0 %v851_v51  ;;  %902 = vmatprep.subr.mxu1 %v839_v54  ;;  %v837_v51 = vld [vmem:[%s3070_s3 + $0xc0] sm:$0xff]  ;;  %v822_v54 = vld [vmem:[%s3070_s3 + $0x48] sm:$0xff] }
 0x408   :  { %903 = vmatpush1.msra.mxu1 %v838_v2  ;;  %v817_v2 = vld [vmem:[%s3070_s3 + $0x20] sm:$0xff] }
 0x409   :  { %904 = vmatprep.subr.mxu1 %v834_v3  ;;  %v81_v3 = vld [vmem:[#allocation2 + $0x4] ss:$8 sm:$0xf] }
 0x40a   :  { %905 = vmatpush1.msra.mxu1 %v833_v62  ;;  %v82_v62 = vld [vmem:[#allocation2 + $0x4] ss:$8 sm:$0x10] }
 0x40b   :  { %906 = vmatprep.subr.mxu1 %v829_v6  ;;  %v83_v6 = vor.u32 %v82_v62, %v81_v3 }
 0x40c   :  { %907 = vmatpush1.msra.mxu1 %v828_v63  ;;  %v856_v63 = vsub.s32 0, %v2499_v47 }
 0x40d   :  { %908 = vmatprep.subr.mxu1 %v824_v8  ;;  %v864_v8 = vsub.s32 2, %v2499_v47 }
 0x40e   :  { %909 = vmatpush1.msra.mxu1 %v823_v11  ;;  %v857_v11 = vrot.slane %v83_v6, %v856_v63 }
 0x40f   :  { %910 = vmatprep.subr.mxu1 %v819_v12  ;;  %v865_v12 = vrot.slane %v83_v6, %v864_v8 }
 0x410   :  { %911 = vmatpush1.msra.mxu1 %v818_v14 }
 0x411   :  { %912 = vmatprep.subr.mxu1 %v814_v15 }
 0x412   :  { %913 = vmatpush1.msra.mxu1 %v813_v16 }
 0x413   :  { %2106 = vmatprep.subr.mxu1 %v2280_v37 }
 0x4bb   :  { %v727_v17 = vpop.f32.mrf.mxu0 }
 0x4bc   :  { %v731_v18 = vmul.f32 %v2697_v29, %v727_v17  ;;  %v845_v29 = vld [vmem:[%s3070_s3 + $0x100] sm:$0xff] }
 0x4bd   :  { %v2090_v13 = vpop.f32.mrf.mxu0 }
 0x4be   :  { %v732_v61 = vsel %vm569_vm4, %v731_v18, 0.0  ;;  %v860_v18 = vsub.s32 1, %v2499_v47  ;;  %vm1449_vm4 = vcmask 1040384  }
 0x4bf   :  { %v733_v21 = vrot.slane %v732_v61, 4 }
 0x4c1   :  { %v734_v22 = vadd.f32 %v733_v21, %v732_v61  ;;  %v868_v61 = vsub.s32 3, %v2499_v47 }
 0x4c3   :  { %v735_v23 = vrot.slane %v734_v22, 2 }
 0x4c5   :  { %v736_v28 = vadd.f32 %v735_v23, %v734_v22  ;;  %v861_v22 = vrot.slane %v83_v6, %v860_v18 }
 0x4c7   :  { %v737_v4 = vrot.slane %v736_v28, 1 }
 0x4c9   :  { %v738_v24 = vadd.f32 %v737_v4, %v736_v28  ;;  %v869_v4 = vrot.slane %v83_v6, %v868_v61 }
 0x4cb   :  { %v739_v30 = vmul.f32 %v738_v24, %v2482_v60  ;;  %v840_v60 = vld [vmem:[%s3070_s3 + $0xd8] sm:$0xff]  ;;  %s2289_s3 = smov 96  }
 0x4cd   :  { %2104 = vmatmul.mubr.msk.f32.vlgmr.msra.gmra.mxu0 %vm576_vm5, %v739_v30 }
 0x4ce   :  { %970 = vmatpush1.msra.mxu0 %v850_v31  ;;  %1017 = vmatprep.mubr.f32.mxu0 %v2280_v37 }
 0x4cf   :  { %971 = vmatprep.subr.mxu0 %v846_v32 }
 0x4d0   :  { %972 = vmatpush1.msra.mxu0 %v845_v29 }
 0x4d1   :  { %973 = vmatprep.subr.mxu0 %v841_v33 }
 0x4d2   :  { %974 = vmatpush1.msra.mxu0 %v840_v60 }
 0x4d3   :  { %975 = vmatprep.subr.mxu0 %v836_v34 }
 0x4d4   :  { %976 = vmatpush1.msra.mxu0 %v835_v36 }
 0x4d5   :  { %977 = vmatprep.subr.mxu0 %v831_v38 }
 0x4d6   :  { %978 = vmatpush1.msra.mxu0 %v830_v19 }
 0x4d7   :  { %979 = vmatprep.subr.mxu0 %v826_v42 }
 0x4d8   :  { %980 = vmatpush1.msra.mxu0 %v825_v43 }
 0x4d9   :  { %981 = vmatprep.subr.mxu0 %v821_v45 }
 0x4da   :  { %982 = vmatpush1.msra.mxu0 %v820_v55  ;;  %v1160_v55 = vsel %vm1154_vm9, %v1153_v7, %v1148_v10  ;;  %vm1456_vm9 = vcmask 1044480  }
 0x4db   :  { %983 = vmatprep.subr.mxu0 %v816_v46  ;;  %v872_v46 = vsub.s32 4, %v2499_v47  ;;  %v2958_v47 = vpop.permute.xlu1 %1327 }
 0x4dc   :  { %984 = vmatpush1.msra.mxu0 %v815_v57 }
 0x4dd   :  { %2125 = vmatprep.subr.mxu0 %v2280_v37  ;;  %v873_v57 = vrot.slane %v83_v6, %v872_v46  ;;  %v87_v46 = vld [vmem:[#allocation4 + $0x18] sm:$0xff] }
 0x58d   :  { %v809_v9 = vpop.f32.mrf.mxu0 }
 0x58e   :  { %1908 = vmatmul.mubr.msk.f32.vlgmr.msra.gmra.mxu1 %vm211_vm1, %v809_v9  ;;  %1909 = vmatmul.mubr.msk.f32.vlgmr.msra.gmra.mxu0 %vm211_vm1, %v809_v9 }
 0x58f   :  { %2107 = vmatpush3.msra.mxu1 %v852_v0  ;;  %v2105_v48 = vpop.f32.mrf.mxu0  ;;  %2122 = vmatprep.mubr.msk.f32.mxu1 %vm2281_vm2, %v2280_v37 }
 0x590   :  { %2108 = vmatprep.subr.mxu1 %v2280_v37  ;;  %2127 = vmatprep.mubr.msk.f32.mxu0 %vm2281_vm2, %v2280_v37 }
 0x591   :  { %2109 = vmatpush3.msra.mxu1 %v847_v1 }
 0x592   :  { %2110 = vmatprep.subr.mxu1 %v2280_v37 }
 0x593   :  { %2111 = vmatpush3.msra.mxu1 %v842_v50 }
 0x594   :  { %2112 = vmatprep.subr.mxu1 %v2280_v37 }
 0x595   :  { %2113 = vmatpush3.msra.mxu1 %v837_v51 }
 0x596   :  { %2114 = vmatprep.subr.mxu1 %v2280_v37 }
 0x597   :  { %2115 = vmatpush3.msra.mxu1 %v832_v52 }
 0x598   :  { %2116 = vmatprep.subr.mxu1 %v2280_v37 }
 0x599   :  { %2117 = vmatpush3.msra.mxu1 %v827_v53 }
 0x59a   :  { %2118 = vmatprep.subr.mxu1 %v2280_v37 }
 0x59b   :  { %2119 = vmatpush3.msra.mxu1 %v822_v54 }
 0x59c   :  { %2120 = vmatprep.subr.mxu1 %v2280_v37 }
 0x59d   :  { %2121 = vmatpush3.msra.mxu1 %v817_v2 }
 0x59e   :  { %2123 = vmatmul.mubr.msk.f32.vlgmr.msra.gmra.mxu1 %vm211_vm1, %v809_v9  ;;  %2136 = vmatprep.subr.mxu1 %v2280_v37 }
 0x59f   :  { %2138 = vmatprep.mubr.msk.f32.mxu1 %vm2281_vm2, %v2280_v37 }
 0x64e   :  { %v948_v14 = vpop.f32.mrf.mxu1  ;;  %v1019_v15 = vpop.f32.mrf.mxu0 }
 0x64f   :  { %v2916_v16 = vadd.f32 %v948_v14, %v857_v11  ;;  %v1020_v17 = vadd.f32 %v1019_v15, %v865_v12 }
 0x650   :  { %v950_v28 = vpop.f32.mrf.mxu1  ;;  %v1021_v30 = vpop.f32.mrf.mxu0 }
 0x651   :  { %1557 = vrot.lane.b32.xlu0 %v2916_v16, %s2287_s15  ;;  %v1416_v13 = vrot.slane %v1020_v17, 5  ;;  %v1402_v21 = vrot.slane %v2916_v16, 7  ;;  %v1423_v23 = vrot.slane %v1020_v17, 4  ;;  %v1428_v24 = vrot.slane %v1020_v17, 3 }
 0x652   :  { %v951_v31 = vadd.f32 %v950_v28, %v861_v22  ;;  %v1022_v32 = vadd.f32 %v1021_v30, %v869_v4  ;;  %v1566_v29 = vrot.slane %v1020_v17, 6  ;;  %v1555_v8 = vrot.slane %v2916_v16, 1 }
 0x653   :  { %1419 = vrot.lane.b32.xlu1 %v1416_v13, %s2285_s13 }
 0x654   :  { %v1441_v60 = vrot.slane %v1022_v32, 1  ;;  %v1410_v36 = vrot.slane %v951_v31, 6  ;;  %v1403_v38 = vrot.slane %v951_v31, 7  ;;  %v1576_v19 = vrot.slane %v1022_v32, 4 }
 0x655   :  { %1404 = vrot.lane.b32.xlu0 %v1402_v21, %s2287_s15  ;;  %v1436_v42 = vrot.slane %v1022_v32, 2  ;;  %v1415_v43 = vrot.slane %v951_v31, 5  ;;  %v1429_v45 = vrot.slane %v1022_v32, 3 }
 0x657   :  { %1424 = vrot.lane.b32.xlu1 %v1423_v23, %s2289_s3 }
 0x659   :  { %1430 = vrot.lane.b32.xlu0 %v1428_v24, %s2284_s4 }
 0x65b   :  { %1559 = vrot.lane.b32.xlu1 %v951_v31, %s2287_s15 }
 0x65d   :  { %1573 = vrot.lane.b32.xlu0 %v1416_v13, %s2289_s3 }
 0x65e   :  { %v1090_v33 = vpop.f32.mrf.mxu1 }
 0x65f   :  { %1569 = vrot.lane.b32.xlu1 %v1566_v29, %s2285_s13  ;;  %v1091_v0 = vadd.f32 %v1090_v33, %v873_v57 }
 0x660   :  { %v2124_v34 = vpop.f32.mrf.mxu1 }
 0x661   :  { %1443 = vrot.lane.b32.xlu0 %v1441_v60, %s2279_s10  ;;  %v1442_v9 = vrot.slane %v1091_v0, 1  ;;  %v1586_v40 = vrot.slane %v1091_v0, 2 }
 0x663   :  { %1577 = vrot.lane.b32.xlu1 %v1423_v23, %s2284_s4 }
 0x665   :  { %1567 = vrot.lane.b32.xlu0 %v1410_v36, %s2285_s13 }
 0x667   :  { %1406 = vrot.lane.b32.xlu1 %v1403_v38, %s2287_s15 }
 0x669   :  { %1579 = vrot.lane.b32.xlu0 %v1576_v19, %s2284_s4 }
 0x66b   :  { %1411 = vrot.lane.b32.xlu1 %v1410_v36, %s2290_s17  ;;  %v1385_v36 = vsel %vm1381_vm15, %v2727_v20, %v2734_v27 }
 0x66c   :  { %v1391_v57 = vsel %vm211_vm1, %v1385_v36, %v2738_v35 }
 0x66d   :  { %1587 = vrot.lane.b32.xlu0 %v1436_v42, %s2279_s10  ;;  %v1397_v35 = vmul.f32 %v1391_v57, %v87_v46 }
 0x66f   :  { %1417 = vrot.lane.b32.xlu1 %v1415_v43, %s2285_s13 }
 0x671   :  { %1249 = vrot.lane.b32.xlu0 %v2491_v41, %s2282_s1  ;;  %v2956_v41 = vpop.permute.xlu0 %1309 }
 0x672   :  { %v1384_v20 = vsel %vm1381_vm15, %v2742_v39, %v2956_v41 }
 0x673   :  { %1432 = vrot.lane.b32.xlu1 %v1429_v45, %s2284_s4  ;;  %v1390_v39 = vsel %vm211_vm1, %v1384_v20, %v2958_v47 }
 0x675   :  { %1273 = vrot.lane.b32.xlu0 %v1160_v55, %s2285_s13  ;;  %v85_v55 = vld [vmem:[#allocation4 + $0x8] sm:$0xff] }
 0x677   :  { %1437 = vrot.lane.b32.xlu1 %v1436_v42, %s2291_s5 }
 0x679   :  { %1315 = vrot.lane.b32.xlu0 %v2508_v56, %s2287_s15  ;;  %v2960_v56 = vpop.permute.xlu0 %1313 }
 0x67b   :  { %1563 = vrot.lane.b32.xlu1 %v1403_v38, %s2290_s17 }
 0x67f   :  { %1583 = vrot.lane.b32.xlu1 %v1429_v45, %s2291_s5 }
 0x683   :  { %1445 = vrot.lane.b32.xlu1 %v1442_v9, %s2279_s10 }
 0x687   :  { %1589 = vrot.lane.b32.xlu1 %v1586_v40, %s2279_s10  ;;  %v1386_v40 = vsel %vm1381_vm15, %v2748_v49, %v2960_v56 }
 0x68b   :  { %1331 = vrot.lane.b32.xlu1 %v2613_v44, %s2288_s16 }
 0x68f   :  { %1297 = vrot.lane.b32.xlu1 %v2575_v25, %s2286_s14 }
 0x693   :  { %1333 = vrot.lane.b32.xlu1 %v2531_v5, %s2288_s16 }
 0x6c3   :  { %v1558_v7 = vpop.permute.xlu0 %1557 }
 0x6c5   :  { %v1420_v10 = vpop.permute.xlu1 %1419 }
 0x6c7   :  { %v1405_v50 = vpop.permute.xlu0 %1404 }
 0x6c9   :  { %v1425_v1 = vpop.permute.xlu1 %1424 }
 0x6cb   :  { %v1431_v52 = vpop.permute.xlu0 %1430 }
 0x6cd   :  { %v1560_v48 = vpop.permute.xlu1 %1559 }
 0x6ce   :  { %v1561_v63 = vsel %vm1381_vm15, %v1558_v7, %v1560_v48  ;;  %v86_v7 = vld [vmem:[#allocation4 + $0x10] sm:$0xff] }
 0x6cf   :  { %v1574_v54 = vpop.permute.xlu0 %1573  ;;  %v1593_v15 = vsel %vm1449_vm4, %v1555_v8, %v1561_v63  ;;  %v1396_v49 = vmul.f32 %v1390_v39, %v86_v7 }
 0x6d1   :  { %v1570_v51 = vpop.permute.xlu1 %1569 }
 0x6d3   :  { %v1444_v2 = vpop.permute.xlu0 %1443 }
 0x6d5   :  { %v1578_v44 = vpop.permute.xlu1 %1577 }
 0x6d7   :  { %v1568_v62 = vpop.permute.xlu0 %1567 }
 0x6d8   :  { %v1571_v61 = vsel %vm1368_vm14, %v1568_v62, %v1570_v51 }
 0x6d9   :  { %v1407_v53 = vpop.permute.xlu1 %1406 }
 0x6da   :  { %v1408_v11 = vsel %vm1381_vm15, %v1405_v50, %v1407_v53 }
 0x6db   :  { %v1580_v12 = vpop.permute.xlu0 %1579  ;;  %v1450_v13 = vsel %vm1449_vm4, %v2916_v16, %v1408_v11  ;;  %v84_v16 = vld [vmem:[#allocation4] sm:$0xff] }
 0x6dc   :  { %v1581_v33 = vsel %vm1355_vm13, %v1578_v44, %v1580_v12  ;;  %v1394_v43 = vmul.f32 %v2713_v58, %v84_v16  ;;  %v1395_v58 = vmul.f32 %v2732_v26, %v85_v55  ;;  %v89_v44 = vld [vmem:[#allocation4 + $0x28] sm:$0xff] }
 0x6dd   :  { %v1412_v25 = vpop.permute.xlu1 %1411 }
 0x6de   :  { %v1451_v21 = vsel %vm658_vm3, %v1450_v13, %v1412_v25 }
 0x6df   :  { %v1588_v4 = vpop.permute.xlu0 %1587 }
 0x6e1   :  { %v1418_v3 = vpop.permute.xlu1 %1417 }
 0x6e2   :  { %v1421_v17 = vsel %vm1368_vm14, %v1418_v3, %v1420_v10 }
 0x6e3   :  { %v1453_v22 = vsel %vm1452_vm7, %v1451_v21, %v1421_v17  ;;  %v1250_v42 = vpop.permute.xlu0 %1249 }
 0x6e4   :  { %v1455_v30 = vsel %vm1454_vm8, %v1453_v22, %v1425_v1  ;;  %v88_v1 = vld [vmem:[#allocation4 + $0x20] sm:$0xff]  ;;  %v1367_v26 = vsel %vm91_vm0, %v2752_v59, %v1250_v42 }
 0x6e5   :  { %v1433_v5 = vpop.permute.xlu1 %1432 }
 0x6e6   :  { %v1434_v24 = vsel %vm1355_vm13, %v1431_v52, %v1433_v5 }
 0x6e7   :  { %v1457_v32 = vsel %vm1456_vm9, %v1455_v30, %v1434_v24  ;;  %v1274_v41 = vpop.permute.xlu0 %1273 }
 0x6e8   :  { %v1374_v47 = vsel %vm1368_vm14, %v1367_v26, %v1274_v41  ;;  %v79_v41 = vld [vmem:[#allocation2 + $0x3] ss:$0 sm:$0xff] }
 0x6e9   :  { %v1438_v6 = vpop.permute.xlu1 %1437 }
 0x6ea   :  { %v1459_v60 = vsel %vm1458_vm10, %v1457_v32, %v1438_v6 }
 0x6eb   :  { %v1316_v52 = vpop.permute.xlu0 %1315 }
 0x6ed   :  { %v1564_v14 = vpop.permute.xlu1 %1563 }
 0x6ee   :  { %v1594_v18 = vsel %vm658_vm3, %v1593_v15, %v1564_v14 }
 0x6ef   :  { %v1595_v23 = vsel %vm1452_vm7, %v1594_v18, %v1571_v61 }
 0x6f0   :  { %v1596_v31 = vsel %vm1454_vm8, %v1595_v23, %v1574_v54 }
 0x6f1   :  { %v1584_v28 = vpop.permute.xlu1 %1583  ;;  %v1597_v38 = vsel %vm1456_vm9, %v1596_v31, %v1581_v33 }
 0x6f2   :  { %v1598_v0 = vsel %vm1458_vm10, %v1597_v38, %v1584_v28 }
 0x6f5   :  { %v1446_v29 = vpop.permute.xlu1 %1445 }
 0x6f6   :  { %v1447_v34 = vsel %vm1341_vm11, %v1444_v2, %v1446_v29  ;;  %v75_v2 = vld [vmem:[%s3069_s2 + $0x20] sm:$0xff] }
 0x6f7   :  { %v1461_v19 = vsel %vm1460_vm12, %v1459_v60, %v1447_v34 }
 0x6f8   :  { %2126 = vmatpush3.xpose.msk.msra.mxu0 %vm1462_vm6, %v1461_v19 }
 0x6f9   :  { %v1590_v45 = vpop.permute.xlu1 %1589  ;;  %2147 = vmatprep.subr.mxu0 %v75_v2 }
 0x6fa   :  { %v1591_v9 = vsel %vm1341_vm11, %v1588_v4, %v1590_v45 }
 0x6fb   :  { %v1599_v27 = vsel %vm1460_vm12, %v1598_v0, %v1591_v9  ;;  %2128 = vmatmul.mubr.msk.f32.vlgmr.msra.gmra.mxu0 %vm1462_vm6, %v1394_v43 }
 0x6fc   :  { %2137 = vmatpush3.xpose.msk.msra.mxu1 %vm1462_vm6, %v1599_v27  ;;  %2130 = vmatprep.mubr.msk.f32.mxu0 %vm2281_vm2, %v2280_v37 }
 0x6fd   :  { %v1332_v10 = vpop.permute.xlu1 %1331  ;;  %2148 = vmatpush3.msra.mxu0 %v75_v2  ;;  %v2229_v2 = vld [vmem:[%s3067_s0 + $0x10] sm:$0xff] }
 0x6fe   :  { %v1392_v48 = vsel %vm211_vm1, %v1386_v40, %v1332_v10 }
 0x6ff   :  { %2131 = vmatmul.mubr.msk.f32.gmra.mxu0 %vm1462_vm6, %v1395_v58  ;;  %2139 = vmatmul.mubr.msk.f32.vlgmr.msra.gmra.mxu1 %vm1462_vm6, %v1397_v35  ;;  %v1398_v56 = vmul.f32 %v1392_v48, %v88_v1 }
 0x700   :  { %2133 = vmatprep.mubr.msk.f32.mxu0 %vm2281_vm2, %v2280_v37  ;;  %2141 = vmatprep.mubr.msk.f32.mxu1 %vm2281_vm2, %v2280_v37 }
 0x701   :  { %v1298_v50 = vpop.permute.xlu1 %1297 }
 0x702   :  { %v1380_v51 = vsel %vm576_vm5, %v1374_v47, %v1298_v50  ;;  %v2227_v50 = vld [vmem:[%s3067_s0] sm:$0xff] }
 0x703   :  { %2134 = vmatmul.mubr.msk.f32.gmra.mxu0 %vm1462_vm6, %v1396_v49  ;;  %2142 = vmatmul.mubr.msk.f32.gmra.mxu1 %vm1462_vm6, %v1398_v56  ;;  %v1387_v53 = vsel %vm1381_vm15, %v1380_v51, %v1316_v52  ;;  %v2226_v49 = vld [vmem:[%s3067_s0 + $0x8] sm:$0xff] }
 0x704   :  { %2144 = vmatprep.mubr.msk.f32.mxu1 %vm2281_vm2, %v2280_v37 }
 0x705   :  { %v1334_v59 = vpop.permute.xlu1 %1333 }
 0x706   :  { %v1393_v54 = vsel %vm211_vm1, %v1387_v53, %v1334_v59  ;;  %v2228_v53 = vld [vmem:[%s3067_s0 + $0x18] sm:$0xff] }
 0x707   :  { %v1399_v25 = vmul.f32 %v1393_v54, %v89_v44 }
 0x709   :  { %2145 = vmatmul.mubr.msk.f32.gmra.mxu1 %vm1462_vm6, %v1399_v25 }
 0x7bb   :  { %v1541_v3 = vpop.f32.mrf.mxu0 }
 0x7bc   :  { %v1919_v5 = vmul.f32 -1.702, %v1541_v3 }
 0x7bd   :  { %v2129_v62 = vpop.f32.mrf.mxu0 }
 0x7be   :  { %v1704_v6 = vmul.f32 1.442695, %v1919_v5 }
 0x7bf   :  { %v1546_v63 = vpop.f32.mrf.mxu0  ;;  %v1678_v37 = vpop.f32.mrf.mxu1 }
 0x7c0   :  { %2202 = vpow2.f32 %v1704_v6  ;;  %v1920_v8 = vmul.f32 -1.702, %v1546_v63  ;;  %v1922_v11 = vmul.f32 -1.702, %v1678_v37 }
 0x7c1   :  { %v2132_v12 = vpop.f32.mrf.mxu0  ;;  %v2140_v14 = vpop.f32.mrf.mxu1 }
 0x7c2   :  { %v1706_v15 = vmul.f32 1.442695, %v1920_v8  ;;  %v1710_v17 = vmul.f32 1.442695, %v1922_v11  ;;  %v2231_v11 = vld [vmem:[%s3067_s0 + $0x20] sm:$0xff] }
 0x7c3   :  { %v1551_v18 = vpop.f32.mrf.mxu0  ;;  %v1683_v13 = vpop.f32.mrf.mxu1 }
 0x7c4   :  { %2204 = vpow2.f32 %v1706_v15  ;;  %v1921_v61 = vmul.f32 -1.702, %v1551_v18  ;;  %v1923_v21 = vmul.f32 -1.702, %v1683_v13 }
 0x7c5   :  { %2206 = vpow2.f32 %v1710_v17  ;;  %v2135_v22 = vpop.f32.mrf.mxu0  ;;  %v2143_v23 = vpop.f32.mrf.mxu1 }
 0x7c6   :  { %v1708_v28 = vmul.f32 1.442695, %v1921_v61  ;;  %v1712_v4 = vmul.f32 1.442695, %v1923_v21 }
 0x7c8   :  { %2208 = vpow2.f32 %v1708_v28 }
 0x7c9   :  { %2210 = vpow2.f32 %v1712_v4  ;;  %v1688_v24 = vpop.f32.mrf.mxu1 }
 0x7ca   :  { %v1924_v30 = vmul.f32 -1.702, %v1688_v24 }
 0x7cb   :  { %v2146_v31 = vpop.f32.mrf.mxu1 }
 0x7cc   :  { %v1714_v32 = vmul.f32 1.442695, %v1924_v30 }
 0x7cd   :  { %v2203_v29 = vpop.eup %2202 }
 0x7ce   :  { %v1716_v16 = vadd.f32 1.0, %v2203_v29  ;;  %2212 = vpow2.f32 %v1714_v32 }
 0x7d0   :  { %2214 = vrcp.f32 %v1716_v16 }
 0x7d1   :  { %v2205_v33 = vpop.eup %2204 }
 0x7d2   :  { %v2207_v60 = vpop.eup %2206  ;;  %v1717_v34 = vadd.f32 1.0, %v2205_v33 }
 0x7d3   :  { %v1719_v36 = vadd.f32 1.0, %v2207_v60 }
 0x7d4   :  { %2216 = vrcp.f32 %v1717_v34 }
 0x7d5   :  { %v2209_v38 = vpop.eup %2208  ;;  %2218 = vrcp.f32 %v1719_v36 }
 0x7d6   :  { %v2211_v19 = vpop.eup %2210  ;;  %v1718_v42 = vadd.f32 1.0, %v2209_v38 }
 0x7d7   :  { %v1720_v43 = vadd.f32 1.0, %v2211_v19 }
 0x7d8   :  { %2220 = vrcp.f32 %v1718_v42 }
 0x7d9   :  { %2222 = vrcp.f32 %v1720_v43 }
 0x7db   :  { %v2213_v45 = vpop.eup %2212 }
 0x7dc   :  { %v1721_v55 = vadd.f32 1.0, %v2213_v45 }
 0x7dd   :  { %v2215_v46 = vpop.eup %2214 }
 0x7de   :  { %v1734_v57 = vmul.f32 %v2215_v46, %v1541_v3  ;;  %2224 = vrcp.f32 %v1721_v55 }
 0x7e0   :  { %2149 = vmatprep.mubr.msk.f32.mxu0 %vm1341_vm11, %v1734_v57 }
 0x7e1   :  { %v2217_v0 = vpop.eup %2216 }
 0x7e2   :  { %v1735_v9 = vmul.f32 %v2217_v0, %v1546_v63  ;;  %v2219_v20 = vpop.eup %2218  ;;  %v2230_v63 = vld [vmem:[%s3067_s0 + $0x28] sm:$0xff] }
 0x7e3   :  { %v1737_v40 = vmul.f32 %v2219_v20, %v1678_v37 }
 0x7e4   :  { %2150 = vmatmul.mubr.msk.f32.vlgmr.msra.gmra.mxu0 %vm1341_vm11, %v1735_v9 }
 0x7e5   :  { %v2221_v27 = vpop.eup %2220 }
 0x7e6   :  { %v2223_v58 = vpop.eup %2222  ;;  %v1736_v35 = vmul.f32 %v2221_v27, %v1551_v18 }
 0x7e7   :  { %v1738_v10 = vmul.f32 %v2223_v58, %v1683_v13 }
 0x7e8   :  { %2152 = vmatprep.mubr.msk.f32.mxu0 %vm1341_vm11, %v1736_v35 }
 0x7e9   :  { %2153 = vmatmul.mubr.msk.f32.gmra.mxu0 %vm1341_vm11, %v1737_v40 }
 0x7ea   :  { %2155 = vmatprep.mubr.msk.f32.mxu0 %vm1341_vm11, %v1738_v10 }
 0x7eb   :  { %v2225_v7 = vpop.eup %2224 }
 0x7ec   :  { %v1739_v39 = vmul.f32 %v2225_v7, %v1688_v24 }
 0x7ee   :  { %2156 = vmatmul.mubr.msk.f32.gmra.mxu0 %vm1341_vm11, %v1739_v39 }
 0x8a4   :  { %v2151_v1 = vpop.f32.mrf.mxu0 }
 0x8a5   :  { %v1830_v48 = vadd.f32 %v2151_v1, %v79_v41 }
 0x8a6   :  { %v1824_v26 = vpop.f32.mrf.mxu0 }
 0x8a7   :  { %v1854_v47 = vadd.f32 %v2226_v49, %v1830_v48  ;;  %v1825_v56 = vadd.f32 %v1824_v26, %v79_v41 }
 0x8a9   :  { %1860 = vst.msk [vmem:[%s3074_s7 + $0x8] sm:$0xff] %vm91_vm0, %v1854_v47  ;;  %v1853_v51 = vadd.f32 %v2227_v50, %v1825_v56  ;;  %v2154_v52 = vpop.f32.mrf.mxu0 }
 0x8aa   :  { %v1840_v44 = vadd.f32 %v2154_v52, %v79_v41 }
 0x8ab   :  { %1859 = vst.msk [vmem:[%s3074_s7] sm:$0xff] %vm91_vm0, %v1853_v51  ;;  %v1834_v59 = vpop.f32.mrf.mxu0 }
 0x8ac   :  { %v1856_v54 = vadd.f32 %v2228_v53, %v1840_v44  ;;  %v1835_v25 = vadd.f32 %v1834_v59, %v79_v41 }
 0x8ae   :  { %1862 = vst.msk [vmem:[%s3074_s7 + $0x18] sm:$0xff] %vm91_vm0, %v1856_v54  ;;  %v1855_v3 = vadd.f32 %v2229_v2, %v1835_v25  ;;  %v2157_v5 = vpop.f32.mrf.mxu0 }
 0x8af   :  { %v1850_v62 = vadd.f32 %v2157_v5, %v79_v41 }
 0x8b0   :  { %1861 = vst.msk [vmem:[%s3074_s7 + $0x10] sm:$0xff] %vm91_vm0, %v1855_v3  ;;  %v1844_v6 = vpop.f32.mrf.mxu0 }
 0x8b1   :  { %v1858_v37 = vadd.f32 %v2230_v63, %v1850_v62  ;;  %v1845_v8 = vadd.f32 %v1844_v6, %v79_v41 }
 0x8b3   :  { %1864 = vst.msk [vmem:[%s3074_s7 + $0x28] sm:$0xff] %vm91_vm0, %v1858_v37  ;;  %v1857_v12 = vadd.f32 %v2231_v11, %v1845_v8 }
 0x8b5   :  { %1863 = vst.msk [vmem:[%s3074_s7 + $0x20] sm:$0xff] %vm91_vm0, %v1857_v12 }
 0x8b6   :  { %1869 = vsyncpa [#allocation3], 1 }
 0x8b7   :  { %1870 = vsyncpa [#allocation5], 1 }

</bundles_post_ra>
